<compile_context>
chip_gen: v7x
topology: tpu7x:2x2x1
jax: 0.10.0
libtpu: 0.0.40
codegen_flags: <defaults>
</compile_context>

<pallas_src>
import jax
import jax.numpy as jnp
from jax.experimental import pallas as pl
from jax.experimental.pallas import tpu as pltpu

IN_FEATURES = 512     # 512 * expansion (expansion=1 here; expansion=0 is degenerate)
HIDDEN = 2048
OUT_FEATURES = 128

# TODO(synk): the conv/BatchNorm residual path of the original preact bottleneck
# block is not part of this fused projection kernel; this preserves the forward
# semantics validated in the previous revision (relu(x@W1+b1)@W2+b2).


def projection_kernel(x_ref, w1_ref, b1_ref, w2_ref, o_ref):
    """One grid step = one batch tile x one hidden shard, full reduction in-step.

    Both matmuls feed the MXU in bf16; accumulation stays f32.
    o_ref is the (tb, OUT) partial for this hidden shard.
    """
    x_bf16 = x_ref[...].astype(jnp.bfloat16)

    # h_shard = relu(x @ W1[:, shard] + b1[shard])            (tb, th) f32
    h = jnp.dot(x_bf16, w1_ref[...], preferred_element_type=jnp.float32)
    h = jnp.maximum(h + b1_ref[...], 0.0)          # (1, th) broadcasts over (tb, th)

    # partial = h_shard @ W2[shard, :]                        (tb, OUT) f32
    o_ref[...] = jnp.dot(h.astype(jnp.bfloat16), w2_ref[...],
                         preferred_element_type=jnp.float32)


def projection_forward(x, w1, b1, w2, b2, *, tb=None, num_shards=2):
    """out = relu(x @ w1 + b1) @ w2 + b2, weights streamed in bf16.

    num_shards: how many independent hidden-dim shards the grid is split into.
      2 (default) lets both v7x TensorCores stream weights in parallel;
      1 is optimal on single-TC chips (v5e/v6e) — a single grid step.
    """
    B, D = x.shape
    H = w1.shape[1]
    O = w2.shape[1]
    if tb is None:
        tb = B
    assert D == IN_FEATURES and H == HIDDEN and O == OUT_FEATURES
    assert b1.shape == (H,) and b2.shape == (O,)
    assert B % tb == 0
    # (8, 128) tiling constraints for the f32 / bf16 blocks used below.
    assert tb == B or tb % 8 == 0, "tb must be a multiple of 8 (or the full batch)"
    assert H % num_shards == 0
    th = H // num_shards
    assert th % 128 == 0 and D % 128 == 0 and O % 128 == 0

    # Stream the heavy operands (the weights) as bf16: halves HBM bytes, which
    # is the entire cost of this kernel.  Biases stay f32 (negligible bytes).
    w1_bf16 = w1.astype(jnp.bfloat16)
    w2_bf16 = w2.astype(jnp.bfloat16)
    b1_2d = b1.astype(jnp.float32).reshape(1, H)

    grid = (num_shards, B // tb)

    partials = pl.pallas_call(
        projection_kernel,
        out_shape=jax.ShapeDtypeStruct((num_shards, B, O), jnp.float32),
        grid_spec=pltpu.PrefetchScalarGridSpec(
            num_scalar_prefetch=0,
            grid=grid,
            in_specs=[
                pl.BlockSpec((tb, D), lambda s, i: (i, 0)),     # x (tiny, re-used)
                pl.BlockSpec((D, th), lambda s, i: (0, s)),     # W1 hidden shard
                pl.BlockSpec((1, th), lambda s, i: (0, s)),     # b1 hidden shard
                pl.BlockSpec((th, O), lambda s, i: (s, 0)),     # W2 hidden shard
            ],
            out_specs=pl.BlockSpec((None, tb, O), lambda s, i: (s, i, 0)),
        ),
        compiler_params=pltpu.CompilerParams(
            # Both axes fully parallel (no cross-step accumulation) -> the shard
            # axis can be split across the two TensorCores on v7x.
            dimension_semantics=("parallel", "parallel"),
        ),
    )(x, w1_bf16, b1_2d, w2_bf16)

    # Tiny epilogue: combine the per-shard partials and add b2.  Fused by XLA
    # when this wrapper is jitted.
    return partials.sum(axis=0) + b2.astype(jnp.float32)


def reference_forward_f32(x, w1, b1, w2, b2):
    h = jnp.maximum(x @ w1 + b1, 0.0)
    return h @ w2 + b2


def reference_forward_bf16(x, w1, b1, w2, b2):
    """Emulates the kernel's bf16 streaming with f32 accumulation."""
    h = jnp.dot(x.astype(jnp.bfloat16), w1.astype(jnp.bfloat16),
                preferred_element_type=jnp.float32) + b1
    h = jnp.maximum(h, 0.0)
    return jnp.dot(h.astype(jnp.bfloat16), w2.astype(jnp.bfloat16),
                   preferred_element_type=jnp.float32) + b2


if __name__ == "__main__":
    key = jax.random.PRNGKey(0)
    kx, kw1, kb1, kw2, kb2 = jax.random.split(key, 5)

    B = 8  # small batch
    x = jax.random.normal(kx, (B, IN_FEATURES), dtype=jnp.float32)

    # Deterministic synthetic parameters (stored as (in, out) = PyTorch W.T)
    w1 = jax.random.normal(kw1, (IN_FEATURES, HIDDEN), dtype=jnp.float32) * (1.0 / IN_FEATURES ** 0.5)
    b1 = jax.random.normal(kb1, (HIDDEN,), dtype=jnp.float32) * 0.01
    w2 = jax.random.normal(kw2, (HIDDEN, OUT_FEATURES), dtype=jnp.float32) * (1.0 / HIDDEN ** 0.5)
    b2 = jax.random.normal(kb2, (OUT_FEATURES,), dtype=jnp.float32) * 0.01

    fwd = jax.jit(projection_forward, static_argnames=("tb", "num_shards"))
    out = fwd(x, w1, b1, w2, b2)
    out = jax.block_until_ready(out)
    assert out.shape == (B, OUT_FEATURES)

    # Tight check vs. a reference that emulates bf16 weight streaming.
    ref_bf16 = reference_forward_bf16(x, w1, b1, w2, b2)
    assert jnp.allclose(out, ref_bf16, atol=5e-3, rtol=5e-3), "mismatch vs bf16 reference"

    # Loose sanity check vs. the full-f32 reference (bf16 quantization noise only).
    ref_f32 = reference_forward_f32(x, w1, b1, w2, b2)
    assert jnp.allclose(out, ref_f32, atol=5e-2, rtol=5e-2), "mismatch vs f32 reference"

    print("KERNEL_OK")
</pallas_src>

<mosaic_0001>
module attributes {stable_mosaic.version = 11 : i64} {
  func.func @projection_kernel(%arg0: i32, %arg1: i32, %arg2: memref<8x512xf32, #tpu.memory_space<vmem>>, %arg3: memref<512x1024xbf16, #tpu.memory_space<vmem>>, %arg4: memref<1x1024xf32, #tpu.memory_space<vmem>>, %arg5: memref<1024x128xbf16, #tpu.memory_space<vmem>>, %arg6: memref<1x8x128xf32, #tpu.memory_space<vmem>>) attributes {dimension_semantics = [#tpu.dimension_semantics<parallel>, #tpu.dimension_semantics<parallel>], iteration_bounds = array<i64: 2, 1>, scalar_prefetch = 0 : i64, scratch_operands = 0 : i64, tpu.core_type = #tpu.core_type<tc>, window_params = [{transform_indices = @transform_0, window_bounds = array<i64: 8, 512>}, {transform_indices = @transform_1, window_bounds = array<i64: 512, 1024>}, {transform_indices = @transform_2, window_bounds = array<i64: 1, 1024>}, {transform_indices = @transform_3, window_bounds = array<i64: 1024, 128>}, {transform_indices = @transform_4, window_bounds = array<i64: 1, 8, 128>}]} {
    %c0 = arith.constant 0 : index
    %c0_0 = arith.constant 0 : index
    %0 = vector.load %arg2[%c0, %c0_0] : memref<8x512xf32, #tpu.memory_space<vmem>>, vector<8x512xf32>
    %1 = arith.truncf %0 : vector<8x512xf32> to vector<8x512xbf16>
    %c0_1 = arith.constant 0 : index
    %c0_2 = arith.constant 0 : index
    %2 = vector.load %arg3[%c0_1, %c0_2] : memref<512x1024xbf16, #tpu.memory_space<vmem>>, vector<512x1024xbf16>
    %cst = arith.constant dense<0.000000e+00> : vector<8x1024xf32>
    %3 = tpu.matmul %1, %2, %cst {dimension_numbers = #tpu.dot_dimension_numbers<[1], [0], [0], [1], [0, 0, 1, 1], [], []>} : vector<8x512xbf16>, vector<512x1024xbf16>, vector<8x1024xf32> -> vector<8x1024xf32>
    %c0_3 = arith.constant 0 : index
    %c0_4 = arith.constant 0 : index
    %4 = vector.load %arg4[%c0_3, %c0_4] : memref<1x1024xf32, #tpu.memory_space<vmem>>, vector<1x1024xf32>
    %5 = vector.broadcast %4 : vector<1x1024xf32> to vector<8x1024xf32>
    %6 = arith.addf %3, %5 : vector<8x1024xf32>
    %cst_5 = arith.constant 0.000000e+00 : f32
    %7 = vector.broadcast %cst_5 : f32 to vector<8x1024xf32>
    %8 = arith.maximumf %6, %7 : vector<8x1024xf32>
    %9 = arith.truncf %8 : vector<8x1024xf32> to vector<8x1024xbf16>
    %c0_6 = arith.constant 0 : index
    %c0_7 = arith.constant 0 : index
    %10 = vector.load %arg5[%c0_6, %c0_7] : memref<1024x128xbf16, #tpu.memory_space<vmem>>, vector<1024x128xbf16>
    %cst_8 = arith.constant dense<0.000000e+00> : vector<8x128xf32>
    %11 = tpu.matmul %9, %10, %cst_8 {dimension_numbers = #tpu.dot_dimension_numbers<[1], [0], [0], [1], [0, 0, 1, 1], [], []>} : vector<8x1024xbf16>, vector<1024x128xbf16>, vector<8x128xf32> -> vector<8x128xf32>
    %c0_9 = arith.constant 0 : index
    %c0_10 = arith.constant 0 : index
    %c0_11 = arith.constant 0 : index
    %12 = vector.load %arg6[%c0_9, %c0_10, %c0_11] : memref<1x8x128xf32, #tpu.memory_space<vmem>>, vector<1x8x128xf32>
    %13 = vector.shape_cast %12 : vector<1x8x128xf32> to vector<8x128xf32>
    %14 = vector.shape_cast %11 : vector<8x128xf32> to vector<1x8x128xf32>
    tpu.vector_store %arg6[%c0_9, %c0_10, %c0_11], %14 {strides = array<i32>} : memref<1x8x128xf32, #tpu.memory_space<vmem>>, vector<1x8x128xf32>,
    return
  }
  func.func @transform_0(%arg0: i32, %arg1: i32) -> (i32, i32) {
    %c0_i32 = arith.constant 0 : i32
    %c0_i32_0 = arith.constant 0 : i32
    return %arg1, %c0_i32 : i32, i32
  }
  func.func @transform_1(%arg0: i32, %arg1: i32) -> (i32, i32) {
    %c0_i32 = arith.constant 0 : i32
    %c0_i32_0 = arith.constant 0 : i32
    return %c0_i32, %arg0 : i32, i32
  }
  func.func @transform_2(%arg0: i32, %arg1: i32) -> (i32, i32) {
    %c0_i32 = arith.constant 0 : i32
    %c0_i32_0 = arith.constant 0 : i32
    return %c0_i32, %arg0 : i32, i32
  }
  func.func @transform_3(%arg0: i32, %arg1: i32) -> (i32, i32) {
    %c0_i32 = arith.constant 0 : i32
    %c0_i32_0 = arith.constant 0 : i32
    return %arg0, %c0_i32 : i32, i32
  }
  func.func @transform_4(%arg0: i32, %arg1: i32) -> (i32, i32, i32) {
    %c0_i32 = arith.constant 0 : i32
    %c0_i32_0 = arith.constant 0 : i32
    return %arg0, %arg1, %c0_i32 : i32, i32, i32
  }
}

</mosaic_0001>

<bundles_post_ra>
// kernel: projection_forward.1
= control target key start
LH: loop header
LB: loop body
LE: loop exit
PB: predicated region body
PF: predicated region fallthrough
CT: control target
= control target key end

     0   :  { %s4144_s15 = smov 0   ;;  %s4146_s16 = smov 0   ;;  %s5114_s0 = inlined_call_operand.vmem [shape: f32[8,512], index: 0, kind: input, shape index: {}]   ;;  %s5115_s1 = inlined_call_operand.vmem [shape: bf16[512,2048], index: 1, kind: input, shape index: {}]   ;;  %s5116_s2 = inlined_call_operand.vmem [shape: f32[1,2048], index: 2, kind: input, shape index: {}]   ;;  %s5117_s3 = inlined_call_operand.vmem [shape: bf16[2048,128], index: 3, kind: input, shape index: {}]   ;;  %s5118_s4 = inlined_call_operand.vmem [shape: f32[2,8,128], index: 4, kind: output, shape index: {}]  }
   0x1   :  { %s4148_s17 = smov 0   ;;  %s4150_s18 = smov 0  }
   0x2   :  { %s4152_s19 = smov 0  }
   0x3 LB: > { %s26_s20 = sadd.s32 1, %s4113_s18  ;;  %p66_p1 = scmp.ne.s32.totalorder %s4105_s16, %s4101_s15  ;;  %s4117_s19 = sphi %s4152_s19, %s14_s19   ;;  %s4113_s18 = sphi %s4150_s18, %s5122_s18   ;;  %s4109_s17 = sphi %s4148_s17, %s5121_s17   ;;  %s4105_s16 = sphi %s4146_s16, %s5120_s16   ;;  %s4101_s15 = sphi %s4144_s15, %s5119_s15  }
   0x4   : > { %p28_p0 = scmp.ge.s32.totalorder %s26_s20, 2  ;;  %p67_p2 = scmp.eq.s32.totalorder %s4117_s19, 0 }
   0x5   : > { %s59_s22 = sadd.s32 1, %s4105_s16  ;;  %p3530_p5 = scmp.ge.s32.totalorder %s4117_s19, 2 }
   0x6   : > { %s5124_s20 = smov (%p28_p0, %s26_s20), 0  ;;  %p68_p3 = por %p67_p2, %p66_p1 }
   0x7   : > { %s56_s21 = ssub.s32 %s4113_s18, %s5124_s20  ;;  %180 = sbr.rel (%p3530_p5) target bundleno = 146 (0x92), region = 20 }
   0x8   : > { %p57_p4 = scmp.eq.s32.totalorder %s56_s21, 0 }
   0xa   : > { %s4179_s23 = scalar_select %p57_p4, %s4105_s16, %s59_s22  }
   0xe   : > { %183 = sbr.rel (!%p68_p3) target bundleno = 146 (0x92), region = 24  ;;  %s185_s24 = sand.u32 (%p68_p3), 1, %s4105_s16  }
   0xf   : > { %s3862_s25 = sshll.u32 (%p68_p3), %s4113_s18, 5  ;;  %s3531_s26 = sshll.u32 (%p68_p3), %s185_s24, 11 }
  0x10   : > { %s4187_s29 = scalar_lea.vmem (%p68_p3), %s5115_s1, %s3862_s25  ;;  %s4192_s30 = scalar_lea.vmem (%p68_p3), [#allocation2], %s3531_s26 }
  0x11   : > { %v203_v0 = vld [vmem:[%s4187_s29] sm:$0xff] (%p68_p3)  ;;  %v205_v1 = vld [vmem:[%s4187_s29 + $0x8] sm:$0xff] (%p68_p3)  ;;  %v207_v2 = vld [vmem:[%s4187_s29 + $0x10] sm:$0xff] (%p68_p3) }
  0x12   : > { %204 = vst [vmem:[%s4192_s30] sm:$0xff] (%p68_p3), %v203_v0  ;;  %206 = vst [vmem:[%s4192_s30 + $0x8] sm:$0xff] (%p68_p3), %v205_v1  ;;  %v209_v3 = vld [vmem:[%s4187_s29 + $0x18] sm:$0xff] (%p68_p3)  ;;  %v211_v4 = vld [vmem:[%s4187_s29 + $0x40] sm:$0xff] (%p68_p3) }
  0x13   : > { %208 = vst [vmem:[%s4192_s30 + $0x10] sm:$0xff] (%p68_p3), %v207_v2  ;;  %v213_v5 = vld [vmem:[%s4187_s29 + $0x48] sm:$0xff] (%p68_p3)  ;;  %210 = vst [vmem:[%s4192_s30 + $0x18] sm:$0xff] (%p68_p3), %v209_v3  ;;  %v215_v6 = vld [vmem:[%s4187_s29 + $0x50] sm:$0xff] (%p68_p3) }
  0x14   : > { %212 = vst [vmem:[%s4192_s30 + $0x20] sm:$0xff] (%p68_p3), %v211_v4  ;;  %214 = vst [vmem:[%s4192_s30 + $0x28] sm:$0xff] (%p68_p3), %v213_v5  ;;  %v217_v7 = vld [vmem:[%s4187_s29 + $0x58] sm:$0xff] (%p68_p3)  ;;  %v219_v8 = vld [vmem:[%s4187_s29 + $0x80] sm:$0xff] (%p68_p3) }
  0x15   : > { %216 = vst [vmem:[%s4192_s30 + $0x30] sm:$0xff] %v215_v6  ;;  %218 = vst [vmem:[%s4192_s30 + $0x38] sm:$0xff] %v217_v7  ;;  %v221_v9 = vld [vmem:[%s4187_s29 + $0x88] sm:$0xff]  ;;  %v223_v10 = vld [vmem:[%s4187_s29 + $0x90] sm:$0xff] }
  0x16   : > { %220 = vst [vmem:[%s4192_s30 + $0x40] sm:$0xff] %v219_v8  ;;  %v225_v11 = vld [vmem:[%s4187_s29 + $0x98] sm:$0xff]  ;;  %222 = vst [vmem:[%s4192_s30 + $0x48] sm:$0xff] %v221_v9  ;;  %v227_v12 = vld [vmem:[%s4187_s29 + $0xc0] sm:$0xff] }
  0x17   : > { %224 = vst [vmem:[%s4192_s30 + $0x50] sm:$0xff] %v223_v10  ;;  %226 = vst [vmem:[%s4192_s30 + $0x58] sm:$0xff] %v225_v11  ;;  %v229_v13 = vld [vmem:[%s4187_s29 + $0xc8] sm:$0xff]  ;;  %v231_v14 = vld [vmem:[%s4187_s29 + $0xd0] sm:$0xff] }
  0x18   : > { %228 = vst [vmem:[%s4192_s30 + $0x60] sm:$0xff] %v227_v12  ;;  %230 = vst [vmem:[%s4192_s30 + $0x68] sm:$0xff] %v229_v13  ;;  %v233_v15 = vld [vmem:[%s4187_s29 + $0xd8] sm:$0xff]  ;;  %v235_v16 = vld [vmem:[%s4187_s29 + $0x100] sm:$0xff] }
  0x19   : > { %232 = vst [vmem:[%s4192_s30 + $0x70] sm:$0xff] %v231_v14  ;;  %v237_v17 = vld [vmem:[%s4187_s29 + $0x108] sm:$0xff]  ;;  %234 = vst [vmem:[%s4192_s30 + $0x78] sm:$0xff] %v233_v15  ;;  %v239_v18 = vld [vmem:[%s4187_s29 + $0x110] sm:$0xff] }
  0x1a   : > { %236 = vst [vmem:[%s4192_s30 + $0x80] sm:$0xff] %v235_v16  ;;  %238 = vst [vmem:[%s4192_s30 + $0x88] sm:$0xff] %v237_v17  ;;  %v241_v19 = vld [vmem:[%s4187_s29 + $0x118] sm:$0xff]  ;;  %v243_v20 = vld [vmem:[%s4187_s29 + $0x140] sm:$0xff] }
  0x1b   : > { %240 = vst [vmem:[%s4192_s30 + $0x90] sm:$0xff] %v239_v18  ;;  %242 = vst [vmem:[%s4192_s30 + $0x98] sm:$0xff] %v241_v19  ;;  %v245_v21 = vld [vmem:[%s4187_s29 + $0x148] sm:$0xff]  ;;  %v247_v22 = vld [vmem:[%s4187_s29 + $0x150] sm:$0xff] }
  0x1c   : > { %244 = vst [vmem:[%s4192_s30 + $0xa0] sm:$0xff] %v243_v20  ;;  %v249_v23 = vld [vmem:[%s4187_s29 + $0x158] sm:$0xff]  ;;  %246 = vst [vmem:[%s4192_s30 + $0xa8] sm:$0xff] %v245_v21  ;;  %v251_v24 = vld [vmem:[%s4187_s29 + $0x180] sm:$0xff] }
  0x1d   : > { %248 = vst [vmem:[%s4192_s30 + $0xb0] sm:$0xff] %v247_v22  ;;  %250 = vst [vmem:[%s4192_s30 + $0xb8] sm:$0xff] %v249_v23  ;;  %v253_v25 = vld [vmem:[%s4187_s29 + $0x188] sm:$0xff]  ;;  %v255_v26 = vld [vmem:[%s4187_s29 + $0x190] sm:$0xff] }
  0x1e   : > { %252 = vst [vmem:[%s4192_s30 + $0xc0] sm:$0xff] %v251_v24  ;;  %254 = vst [vmem:[%s4192_s30 + $0xc8] sm:$0xff] %v253_v25  ;;  %v257_v27 = vld [vmem:[%s4187_s29 + $0x198] sm:$0xff]  ;;  %v259_v28 = vld [vmem:[%s4187_s29 + $0x1c0] sm:$0xff] }
  0x1f   : > { %256 = vst [vmem:[%s4192_s30 + $0xd0] sm:$0xff] %v255_v26  ;;  %v261_v29 = vld [vmem:[%s4187_s29 + $0x1c8] sm:$0xff]  ;;  %258 = vst [vmem:[%s4192_s30 + $0xd8] sm:$0xff] %v257_v27  ;;  %v263_v30 = vld [vmem:[%s4187_s29 + $0x1d0] sm:$0xff] }
  0x20   : > { %260 = vst [vmem:[%s4192_s30 + $0xe0] sm:$0xff] %v259_v28  ;;  %262 = vst [vmem:[%s4192_s30 + $0xe8] sm:$0xff] %v261_v29  ;;  %v265_v31 = vld [vmem:[%s4187_s29 + $0x1d8] sm:$0xff]  ;;  %v267_v32 = vld [vmem:[%s4187_s29 + $0x200] sm:$0xff] }
  0x21   : > { %264 = vst [vmem:[%s4192_s30 + $0xf0] sm:$0xff] %v263_v30  ;;  %266 = vst [vmem:[%s4192_s30 + $0xf8] sm:$0xff] %v265_v31  ;;  %v269_v33 = vld [vmem:[%s4187_s29 + $0x208] sm:$0xff]  ;;  %v271_v34 = vld [vmem:[%s4187_s29 + $0x210] sm:$0xff] }
  0x22   : > { %268 = vst [vmem:[%s4192_s30 + $0x100] sm:$0xff] %v267_v32  ;;  %v273_v35 = vld [vmem:[%s4187_s29 + $0x218] sm:$0xff]  ;;  %270 = vst [vmem:[%s4192_s30 + $0x108] sm:$0xff] %v269_v33  ;;  %v275_v36 = vld [vmem:[%s4187_s29 + $0x240] sm:$0xff] }
  0x23   : > { %272 = vst [vmem:[%s4192_s30 + $0x110] sm:$0xff] %v271_v34  ;;  %274 = vst [vmem:[%s4192_s30 + $0x118] sm:$0xff] %v273_v35  ;;  %v277_v37 = vld [vmem:[%s4187_s29 + $0x248] sm:$0xff]  ;;  %v279_v38 = vld [vmem:[%s4187_s29 + $0x250] sm:$0xff] }
  0x24   : > { %276 = vst [vmem:[%s4192_s30 + $0x120] sm:$0xff] %v275_v36  ;;  %278 = vst [vmem:[%s4192_s30 + $0x128] sm:$0xff] %v277_v37  ;;  %v281_v39 = vld [vmem:[%s4187_s29 + $0x258] sm:$0xff]  ;;  %v283_v40 = vld [vmem:[%s4187_s29 + $0x280] sm:$0xff] }
  0x25   : > { %280 = vst [vmem:[%s4192_s30 + $0x130] sm:$0xff] %v279_v38  ;;  %v285_v41 = vld [vmem:[%s4187_s29 + $0x288] sm:$0xff]  ;;  %282 = vst [vmem:[%s4192_s30 + $0x138] sm:$0xff] %v281_v39  ;;  %v287_v42 = vld [vmem:[%s4187_s29 + $0x290] sm:$0xff] }
  0x26   : > { %284 = vst [vmem:[%s4192_s30 + $0x140] sm:$0xff] %v283_v40  ;;  %286 = vst [vmem:[%s4192_s30 + $0x148] sm:$0xff] %v285_v41  ;;  %v289_v43 = vld [vmem:[%s4187_s29 + $0x298] sm:$0xff]  ;;  %v291_v44 = vld [vmem:[%s4187_s29 + $0x2c0] sm:$0xff] }
  0x27   : > { %288 = vst [vmem:[%s4192_s30 + $0x150] sm:$0xff] %v287_v42  ;;  %290 = vst [vmem:[%s4192_s30 + $0x158] sm:$0xff] %v289_v43  ;;  %v293_v45 = vld [vmem:[%s4187_s29 + $0x2c8] sm:$0xff]  ;;  %v295_v46 = vld [vmem:[%s4187_s29 + $0x2d0] sm:$0xff] }
  0x28   : > { %292 = vst [vmem:[%s4192_s30 + $0x160] sm:$0xff] %v291_v44  ;;  %v297_v47 = vld [vmem:[%s4187_s29 + $0x2d8] sm:$0xff]  ;;  %294 = vst [vmem:[%s4192_s30 + $0x168] sm:$0xff] %v293_v45  ;;  %v299_v48 = vld [vmem:[%s4187_s29 + $0x300] sm:$0xff] }
  0x29   : > { %296 = vst [vmem:[%s4192_s30 + $0x170] sm:$0xff] %v295_v46  ;;  %298 = vst [vmem:[%s4192_s30 + $0x178] sm:$0xff] %v297_v47  ;;  %v301_v49 = vld [vmem:[%s4187_s29 + $0x308] sm:$0xff]  ;;  %v303_v50 = vld [vmem:[%s4187_s29 + $0x310] sm:$0xff] }
  0x2a   : > { %300 = vst [vmem:[%s4192_s30 + $0x180] sm:$0xff] %v299_v48  ;;  %302 = vst [vmem:[%s4192_s30 + $0x188] sm:$0xff] %v301_v49  ;;  %v305_v51 = vld [vmem:[%s4187_s29 + $0x318] sm:$0xff]  ;;  %v307_v52 = vld [vmem:[%s4187_s29 + $0x340] sm:$0xff] }
  0x2b   : > { %304 = vst [vmem:[%s4192_s30 + $0x190] sm:$0xff] %v303_v50  ;;  %v309_v53 = vld [vmem:[%s4187_s29 + $0x348] sm:$0xff]  ;;  %306 = vst [vmem:[%s4192_s30 + $0x198] sm:$0xff] %v305_v51  ;;  %v311_v54 = vld [vmem:[%s4187_s29 + $0x350] sm:$0xff] }
  0x2c   : > { %308 = vst [vmem:[%s4192_s30 + $0x1a0] sm:$0xff] %v307_v52  ;;  %310 = vst [vmem:[%s4192_s30 + $0x1a8] sm:$0xff] %v309_v53  ;;  %v313_v55 = vld [vmem:[%s4187_s29 + $0x358] sm:$0xff]  ;;  %v315_v56 = vld [vmem:[%s4187_s29 + $0x380] sm:$0xff] }
  0x2d   : > { %312 = vst [vmem:[%s4192_s30 + $0x1b0] sm:$0xff] %v311_v54  ;;  %314 = vst [vmem:[%s4192_s30 + $0x1b8] sm:$0xff] %v313_v55  ;;  %v317_v57 = vld [vmem:[%s4187_s29 + $0x388] sm:$0xff]  ;;  %v319_v58 = vld [vmem:[%s4187_s29 + $0x390] sm:$0xff] }
  0x2e   : > { %316 = vst [vmem:[%s4192_s30 + $0x1c0] sm:$0xff] %v315_v56  ;;  %v321_v59 = vld [vmem:[%s4187_s29 + $0x398] sm:$0xff]  ;;  %318 = vst [vmem:[%s4192_s30 + $0x1c8] sm:$0xff] %v317_v57  ;;  %v323_v60 = vld [vmem:[%s4187_s29 + $0x3c0] sm:$0xff] }
  0x2f   : > { %320 = vst [vmem:[%s4192_s30 + $0x1d0] sm:$0xff] %v319_v58  ;;  %322 = vst [vmem:[%s4192_s30 + $0x1d8] sm:$0xff] %v321_v59  ;;  %v325_v61 = vld [vmem:[%s4187_s29 + $0x3c8] sm:$0xff]  ;;  %v327_v62 = vld [vmem:[%s4187_s29 + $0x3d0] sm:$0xff] }
  0x30   : > { %324 = vst [vmem:[%s4192_s30 + $0x1e0] sm:$0xff] %v323_v60  ;;  %326 = vst [vmem:[%s4192_s30 + $0x1e8] sm:$0xff] %v325_v61  ;;  %v329_v63 = vld [vmem:[%s4187_s29 + $0x3d8] sm:$0xff]  ;;  %v331_v0 = vld [vmem:[%s4187_s29 + $0x400] sm:$0xff] }
  0x31   : > { %328 = vst [vmem:[%s4192_s30 + $0x1f0] sm:$0xff] %v327_v62  ;;  %v333_v1 = vld [vmem:[%s4187_s29 + $0x408] sm:$0xff]  ;;  %330 = vst [vmem:[%s4192_s30 + $0x1f8] sm:$0xff] %v329_v63  ;;  %v335_v2 = vld [vmem:[%s4187_s29 + $0x410] sm:$0xff] }
  0x32   : > { %332 = vst [vmem:[%s4192_s30 + $0x200] sm:$0xff] %v331_v0  ;;  %334 = vst [vmem:[%s4192_s30 + $0x208] sm:$0xff] %v333_v1  ;;  %v337_v3 = vld [vmem:[%s4187_s29 + $0x418] sm:$0xff]  ;;  %v339_v4 = vld [vmem:[%s4187_s29 + $0x440] sm:$0xff] }
  0x33   : > { %336 = vst [vmem:[%s4192_s30 + $0x210] sm:$0xff] %v335_v2  ;;  %338 = vst [vmem:[%s4192_s30 + $0x218] sm:$0xff] %v337_v3  ;;  %v341_v5 = vld [vmem:[%s4187_s29 + $0x448] sm:$0xff]  ;;  %v343_v6 = vld [vmem:[%s4187_s29 + $0x450] sm:$0xff] }
  0x34   : > { %340 = vst [vmem:[%s4192_s30 + $0x220] sm:$0xff] %v339_v4  ;;  %v345_v7 = vld [vmem:[%s4187_s29 + $0x458] sm:$0xff]  ;;  %342 = vst [vmem:[%s4192_s30 + $0x228] sm:$0xff] %v341_v5  ;;  %v347_v8 = vld [vmem:[%s4187_s29 + $0x480] sm:$0xff] }
  0x35   : > { %344 = vst [vmem:[%s4192_s30 + $0x230] sm:$0xff] %v343_v6  ;;  %346 = vst [vmem:[%s4192_s30 + $0x238] sm:$0xff] %v345_v7  ;;  %v349_v9 = vld [vmem:[%s4187_s29 + $0x488] sm:$0xff]  ;;  %v351_v10 = vld [vmem:[%s4187_s29 + $0x490] sm:$0xff] }
  0x36   : > { %348 = vst [vmem:[%s4192_s30 + $0x240] sm:$0xff] %v347_v8  ;;  %350 = vst [vmem:[%s4192_s30 + $0x248] sm:$0xff] %v349_v9  ;;  %v353_v11 = vld [vmem:[%s4187_s29 + $0x498] sm:$0xff]  ;;  %v355_v12 = vld [vmem:[%s4187_s29 + $0x4c0] sm:$0xff] }
  0x37   : > { %352 = vst [vmem:[%s4192_s30 + $0x250] sm:$0xff] %v351_v10  ;;  %v357_v13 = vld [vmem:[%s4187_s29 + $0x4c8] sm:$0xff]  ;;  %354 = vst [vmem:[%s4192_s30 + $0x258] sm:$0xff] %v353_v11  ;;  %v359_v14 = vld [vmem:[%s4187_s29 + $0x4d0] sm:$0xff] }
  0x38   : > { %356 = vst [vmem:[%s4192_s30 + $0x260] sm:$0xff] %v355_v12  ;;  %358 = vst [vmem:[%s4192_s30 + $0x268] sm:$0xff] %v357_v13  ;;  %v361_v15 = vld [vmem:[%s4187_s29 + $0x4d8] sm:$0xff]  ;;  %v363_v16 = vld [vmem:[%s4187_s29 + $0x500] sm:$0xff] }
  0x39   : > { %360 = vst [vmem:[%s4192_s30 + $0x270] sm:$0xff] %v359_v14  ;;  %362 = vst [vmem:[%s4192_s30 + $0x278] sm:$0xff] %v361_v15  ;;  %v365_v17 = vld [vmem:[%s4187_s29 + $0x508] sm:$0xff]  ;;  %v367_v18 = vld [vmem:[%s4187_s29 + $0x510] sm:$0xff] }
  0x3a   : > { %364 = vst [vmem:[%s4192_s30 + $0x280] sm:$0xff] %v363_v16  ;;  %v369_v19 = vld [vmem:[%s4187_s29 + $0x518] sm:$0xff]  ;;  %366 = vst [vmem:[%s4192_s30 + $0x288] sm:$0xff] %v365_v17  ;;  %v371_v20 = vld [vmem:[%s4187_s29 + $0x540] sm:$0xff] }
  0x3b   : > { %368 = vst [vmem:[%s4192_s30 + $0x290] sm:$0xff] %v367_v18  ;;  %370 = vst [vmem:[%s4192_s30 + $0x298] sm:$0xff] %v369_v19  ;;  %v373_v21 = vld [vmem:[%s4187_s29 + $0x548] sm:$0xff]  ;;  %v375_v22 = vld [vmem:[%s4187_s29 + $0x550] sm:$0xff] }
  0x3c   : > { %372 = vst [vmem:[%s4192_s30 + $0x2a0] sm:$0xff] %v371_v20  ;;  %374 = vst [vmem:[%s4192_s30 + $0x2a8] sm:$0xff] %v373_v21  ;;  %v377_v23 = vld [vmem:[%s4187_s29 + $0x558] sm:$0xff]  ;;  %v379_v24 = vld [vmem:[%s4187_s29 + $0x580] sm:$0xff] }
  0x3d   : > { %376 = vst [vmem:[%s4192_s30 + $0x2b0] sm:$0xff] %v375_v22  ;;  %v381_v25 = vld [vmem:[%s4187_s29 + $0x588] sm:$0xff]  ;;  %378 = vst [vmem:[%s4192_s30 + $0x2b8] sm:$0xff] %v377_v23  ;;  %v383_v26 = vld [vmem:[%s4187_s29 + $0x590] sm:$0xff] }
  0x3e   : > { %380 = vst [vmem:[%s4192_s30 + $0x2c0] sm:$0xff] %v379_v24  ;;  %382 = vst [vmem:[%s4192_s30 + $0x2c8] sm:$0xff] %v381_v25  ;;  %v385_v27 = vld [vmem:[%s4187_s29 + $0x598] sm:$0xff]  ;;  %v387_v28 = vld [vmem:[%s4187_s29 + $0x5c0] sm:$0xff] }
  0x3f   : > { %384 = vst [vmem:[%s4192_s30 + $0x2d0] sm:$0xff] %v383_v26  ;;  %386 = vst [vmem:[%s4192_s30 + $0x2d8] sm:$0xff] %v385_v27  ;;  %v389_v29 = vld [vmem:[%s4187_s29 + $0x5c8] sm:$0xff]  ;;  %v391_v30 = vld [vmem:[%s4187_s29 + $0x5d0] sm:$0xff] }
  0x40   : > { %388 = vst [vmem:[%s4192_s30 + $0x2e0] sm:$0xff] %v387_v28  ;;  %v393_v31 = vld [vmem:[%s4187_s29 + $0x5d8] sm:$0xff]  ;;  %390 = vst [vmem:[%s4192_s30 + $0x2e8] sm:$0xff] %v389_v29  ;;  %v395_v32 = vld [vmem:[%s4187_s29 + $0x600] sm:$0xff] }
  0x41   : > { %392 = vst [vmem:[%s4192_s30 + $0x2f0] sm:$0xff] %v391_v30  ;;  %394 = vst [vmem:[%s4192_s30 + $0x2f8] sm:$0xff] %v393_v31  ;;  %v397_v33 = vld [vmem:[%s4187_s29 + $0x608] sm:$0xff]  ;;  %v399_v34 = vld [vmem:[%s4187_s29 + $0x610] sm:$0xff] }
  0x42   : > { %396 = vst [vmem:[%s4192_s30 + $0x300] sm:$0xff] %v395_v32  ;;  %398 = vst [vmem:[%s4192_s30 + $0x308] sm:$0xff] %v397_v33  ;;  %v401_v35 = vld [vmem:[%s4187_s29 + $0x618] sm:$0xff]  ;;  %v403_v36 = vld [vmem:[%s4187_s29 + $0x640] sm:$0xff] }
  0x43   : > { %400 = vst [vmem:[%s4192_s30 + $0x310] sm:$0xff] %v399_v34  ;;  %v405_v37 = vld [vmem:[%s4187_s29 + $0x648] sm:$0xff]  ;;  %402 = vst [vmem:[%s4192_s30 + $0x318] sm:$0xff] %v401_v35  ;;  %v407_v38 = vld [vmem:[%s4187_s29 + $0x650] sm:$0xff] }
  0x44   : > { %404 = vst [vmem:[%s4192_s30 + $0x320] sm:$0xff] %v403_v36  ;;  %406 = vst [vmem:[%s4192_s30 + $0x328] sm:$0xff] %v405_v37  ;;  %v409_v39 = vld [vmem:[%s4187_s29 + $0x658] sm:$0xff]  ;;  %v411_v40 = vld [vmem:[%s4187_s29 + $0x680] sm:$0xff] }
  0x45   : > { %408 = vst [vmem:[%s4192_s30 + $0x330] sm:$0xff] %v407_v38  ;;  %410 = vst [vmem:[%s4192_s30 + $0x338] sm:$0xff] %v409_v39  ;;  %v413_v41 = vld [vmem:[%s4187_s29 + $0x688] sm:$0xff]  ;;  %v415_v42 = vld [vmem:[%s4187_s29 + $0x690] sm:$0xff] }
  0x46   : > { %412 = vst [vmem:[%s4192_s30 + $0x340] sm:$0xff] %v411_v40  ;;  %v417_v43 = vld [vmem:[%s4187_s29 + $0x698] sm:$0xff]  ;;  %414 = vst [vmem:[%s4192_s30 + $0x348] sm:$0xff] %v413_v41  ;;  %v419_v44 = vld [vmem:[%s4187_s29 + $0x6c0] sm:$0xff] }
  0x47   : > { %416 = vst [vmem:[%s4192_s30 + $0x350] sm:$0xff] %v415_v42  ;;  %418 = vst [vmem:[%s4192_s30 + $0x358] sm:$0xff] %v417_v43  ;;  %v421_v45 = vld [vmem:[%s4187_s29 + $0x6c8] sm:$0xff]  ;;  %v423_v46 = vld [vmem:[%s4187_s29 + $0x6d0] sm:$0xff] }
  0x48   : > { %420 = vst [vmem:[%s4192_s30 + $0x360] sm:$0xff] %v419_v44  ;;  %422 = vst [vmem:[%s4192_s30 + $0x368] sm:$0xff] %v421_v45  ;;  %v425_v47 = vld [vmem:[%s4187_s29 + $0x6d8] sm:$0xff]  ;;  %v427_v48 = vld [vmem:[%s4187_s29 + $0x700] sm:$0xff] }
  0x49   : > { %424 = vst [vmem:[%s4192_s30 + $0x370] sm:$0xff] %v423_v46  ;;  %v429_v49 = vld [vmem:[%s4187_s29 + $0x708] sm:$0xff]  ;;  %426 = vst [vmem:[%s4192_s30 + $0x378] sm:$0xff] %v425_v47  ;;  %v431_v50 = vld [vmem:[%s4187_s29 + $0x710] sm:$0xff] }
  0x4a   : > { %428 = vst [vmem:[%s4192_s30 + $0x380] sm:$0xff] %v427_v48  ;;  %430 = vst [vmem:[%s4192_s30 + $0x388] sm:$0xff] %v429_v49  ;;  %v433_v51 = vld [vmem:[%s4187_s29 + $0x718] sm:$0xff]  ;;  %v435_v52 = vld [vmem:[%s4187_s29 + $0x740] sm:$0xff] }
  0x4b   : > { %432 = vst [vmem:[%s4192_s30 + $0x390] sm:$0xff] %v431_v50  ;;  %434 = vst [vmem:[%s4192_s30 + $0x398] sm:$0xff] %v433_v51  ;;  %v437_v53 = vld [vmem:[%s4187_s29 + $0x748] sm:$0xff]  ;;  %v439_v54 = vld [vmem:[%s4187_s29 + $0x750] sm:$0xff] }
  0x4c   : > { %436 = vst [vmem:[%s4192_s30 + $0x3a0] sm:$0xff] %v435_v52  ;;  %v441_v55 = vld [vmem:[%s4187_s29 + $0x758] sm:$0xff]  ;;  %438 = vst [vmem:[%s4192_s30 + $0x3a8] sm:$0xff] %v437_v53  ;;  %v443_v56 = vld [vmem:[%s4187_s29 + $0x780] sm:$0xff] }
  0x4d   : > { %440 = vst [vmem:[%s4192_s30 + $0x3b0] sm:$0xff] %v439_v54  ;;  %442 = vst [vmem:[%s4192_s30 + $0x3b8] sm:$0xff] %v441_v55  ;;  %v445_v57 = vld [vmem:[%s4187_s29 + $0x788] sm:$0xff]  ;;  %v447_v58 = vld [vmem:[%s4187_s29 + $0x790] sm:$0xff] }
  0x4e   : > { %444 = vst [vmem:[%s4192_s30 + $0x3c0] sm:$0xff] %v443_v56  ;;  %446 = vst [vmem:[%s4192_s30 + $0x3c8] sm:$0xff] %v445_v57  ;;  %v449_v59 = vld [vmem:[%s4187_s29 + $0x798] sm:$0xff]  ;;  %v451_v60 = vld [vmem:[%s4187_s29 + $0x7c0] sm:$0xff] }
  0x4f   : > { %448 = vst [vmem:[%s4192_s30 + $0x3d0] sm:$0xff] %v447_v58  ;;  %v453_v61 = vld [vmem:[%s4187_s29 + $0x7c8] sm:$0xff]  ;;  %450 = vst [vmem:[%s4192_s30 + $0x3d8] sm:$0xff] %v449_v59  ;;  %v455_v62 = vld [vmem:[%s4187_s29 + $0x7d0] sm:$0xff] }
  0x50   : > { %452 = vst [vmem:[%s4192_s30 + $0x3e0] sm:$0xff] %v451_v60  ;;  %454 = vst [vmem:[%s4192_s30 + $0x3e8] sm:$0xff] %v453_v61  ;;  %v457_v63 = vld [vmem:[%s4187_s29 + $0x7d8] sm:$0xff]  ;;  %v459_v0 = vld [vmem:[%s4187_s29 + $0x800] sm:$0xff] }
  0x51   : > { %456 = vst [vmem:[%s4192_s30 + $0x3f0] sm:$0xff] %v455_v62  ;;  %458 = vst [vmem:[%s4192_s30 + $0x3f8] sm:$0xff] %v457_v63  ;;  %v461_v1 = vld [vmem:[%s4187_s29 + $0x808] sm:$0xff]  ;;  %v463_v2 = vld [vmem:[%s4187_s29 + $0x810] sm:$0xff] }
  0x52   : > { %460 = vst [vmem:[%s4192_s30 + $0x400] sm:$0xff] %v459_v0  ;;  %v465_v3 = vld [vmem:[%s4187_s29 + $0x818] sm:$0xff]  ;;  %462 = vst [vmem:[%s4192_s30 + $0x408] sm:$0xff] %v461_v1  ;;  %v467_v4 = vld [vmem:[%s4187_s29 + $0x840] sm:$0xff] }
  0x53   : > { %464 = vst [vmem:[%s4192_s30 + $0x410] sm:$0xff] %v463_v2  ;;  %466 = vst [vmem:[%s4192_s30 + $0x418] sm:$0xff] %v465_v3  ;;  %v469_v5 = vld [vmem:[%s4187_s29 + $0x848] sm:$0xff]  ;;  %v471_v6 = vld [vmem:[%s4187_s29 + $0x850] sm:$0xff] }
  0x54   : > { %468 = vst [vmem:[%s4192_s30 + $0x420] sm:$0xff] %v467_v4  ;;  %470 = vst [vmem:[%s4192_s30 + $0x428] sm:$0xff] %v469_v5  ;;  %v473_v7 = vld [vmem:[%s4187_s29 + $0x858] sm:$0xff]  ;;  %v475_v8 = vld [vmem:[%s4187_s29 + $0x880] sm:$0xff] }
  0x55   : > { %472 = vst [vmem:[%s4192_s30 + $0x430] sm:$0xff] %v471_v6  ;;  %v477_v9 = vld [vmem:[%s4187_s29 + $0x888] sm:$0xff]  ;;  %474 = vst [vmem:[%s4192_s30 + $0x438] sm:$0xff] %v473_v7  ;;  %v479_v10 = vld [vmem:[%s4187_s29 + $0x890] sm:$0xff] }
  0x56   : > { %476 = vst [vmem:[%s4192_s30 + $0x440] sm:$0xff] %v475_v8  ;;  %478 = vst [vmem:[%s4192_s30 + $0x448] sm:$0xff] %v477_v9  ;;  %v481_v11 = vld [vmem:[%s4187_s29 + $0x898] sm:$0xff]  ;;  %v483_v12 = vld [vmem:[%s4187_s29 + $0x8c0] sm:$0xff] }
  0x57   : > { %480 = vst [vmem:[%s4192_s30 + $0x450] sm:$0xff] %v479_v10  ;;  %482 = vst [vmem:[%s4192_s30 + $0x458] sm:$0xff] %v481_v11  ;;  %v485_v13 = vld [vmem:[%s4187_s29 + $0x8c8] sm:$0xff]  ;;  %v487_v14 = vld [vmem:[%s4187_s29 + $0x8d0] sm:$0xff] }
  0x58   : > { %484 = vst [vmem:[%s4192_s30 + $0x460] sm:$0xff] %v483_v12  ;;  %v489_v15 = vld [vmem:[%s4187_s29 + $0x8d8] sm:$0xff]  ;;  %486 = vst [vmem:[%s4192_s30 + $0x468] sm:$0xff] %v485_v13  ;;  %v491_v16 = vld [vmem:[%s4187_s29 + $0x900] sm:$0xff] }
  0x59   : > { %488 = vst [vmem:[%s4192_s30 + $0x470] sm:$0xff] %v487_v14  ;;  %490 = vst [vmem:[%s4192_s30 + $0x478] sm:$0xff] %v489_v15  ;;  %v493_v17 = vld [vmem:[%s4187_s29 + $0x908] sm:$0xff]  ;;  %v495_v18 = vld [vmem:[%s4187_s29 + $0x910] sm:$0xff] }
  0x5a   : > { %492 = vst [vmem:[%s4192_s30 + $0x480] sm:$0xff] %v491_v16  ;;  %494 = vst [vmem:[%s4192_s30 + $0x488] sm:$0xff] %v493_v17  ;;  %v497_v19 = vld [vmem:[%s4187_s29 + $0x918] sm:$0xff]  ;;  %v499_v20 = vld [vmem:[%s4187_s29 + $0x940] sm:$0xff] }
  0x5b   : > { %496 = vst [vmem:[%s4192_s30 + $0x490] sm:$0xff] %v495_v18  ;;  %v501_v21 = vld [vmem:[%s4187_s29 + $0x948] sm:$0xff]  ;;  %498 = vst [vmem:[%s4192_s30 + $0x498] sm:$0xff] %v497_v19  ;;  %v503_v22 = vld [vmem:[%s4187_s29 + $0x950] sm:$0xff] }
  0x5c   : > { %500 = vst [vmem:[%s4192_s30 + $0x4a0] sm:$0xff] %v499_v20  ;;  %502 = vst [vmem:[%s4192_s30 + $0x4a8] sm:$0xff] %v501_v21  ;;  %v505_v23 = vld [vmem:[%s4187_s29 + $0x958] sm:$0xff]  ;;  %v507_v24 = vld [vmem:[%s4187_s29 + $0x980] sm:$0xff] }
  0x5d   : > { %504 = vst [vmem:[%s4192_s30 + $0x4b0] sm:$0xff] %v503_v22  ;;  %506 = vst [vmem:[%s4192_s30 + $0x4b8] sm:$0xff] %v505_v23  ;;  %v509_v25 = vld [vmem:[%s4187_s29 + $0x988] sm:$0xff]  ;;  %v511_v26 = vld [vmem:[%s4187_s29 + $0x990] sm:$0xff] }
  0x5e   : > { %508 = vst [vmem:[%s4192_s30 + $0x4c0] sm:$0xff] %v507_v24  ;;  %v513_v27 = vld [vmem:[%s4187_s29 + $0x998] sm:$0xff]  ;;  %510 = vst [vmem:[%s4192_s30 + $0x4c8] sm:$0xff] %v509_v25  ;;  %v515_v28 = vld [vmem:[%s4187_s29 + $0x9c0] sm:$0xff] }
  0x5f   : > { %512 = vst [vmem:[%s4192_s30 + $0x4d0] sm:$0xff] %v511_v26  ;;  %514 = vst [vmem:[%s4192_s30 + $0x4d8] sm:$0xff] %v513_v27  ;;  %v517_v29 = vld [vmem:[%s4187_s29 + $0x9c8] sm:$0xff]  ;;  %v519_v30 = vld [vmem:[%s4187_s29 + $0x9d0] sm:$0xff] }
  0x60   : > { %516 = vst [vmem:[%s4192_s30 + $0x4e0] sm:$0xff] %v515_v28  ;;  %518 = vst [vmem:[%s4192_s30 + $0x4e8] sm:$0xff] %v517_v29  ;;  %v521_v31 = vld [vmem:[%s4187_s29 + $0x9d8] sm:$0xff]  ;;  %v523_v32 = vld [vmem:[%s4187_s29 + $0xa00] sm:$0xff] }
  0x61   : > { %520 = vst [vmem:[%s4192_s30 + $0x4f0] sm:$0xff] %v519_v30  ;;  %v525_v33 = vld [vmem:[%s4187_s29 + $0xa08] sm:$0xff]  ;;  %522 = vst [vmem:[%s4192_s30 + $0x4f8] sm:$0xff] %v521_v31  ;;  %v527_v34 = vld [vmem:[%s4187_s29 + $0xa10] sm:$0xff] }
  0x62   : > { %524 = vst [vmem:[%s4192_s30 + $0x500] sm:$0xff] %v523_v32  ;;  %526 = vst [vmem:[%s4192_s30 + $0x508] sm:$0xff] %v525_v33  ;;  %v529_v35 = vld [vmem:[%s4187_s29 + $0xa18] sm:$0xff]  ;;  %v531_v36 = vld [vmem:[%s4187_s29 + $0xa40] sm:$0xff] }
  0x63   : > { %528 = vst [vmem:[%s4192_s30 + $0x510] sm:$0xff] %v527_v34  ;;  %530 = vst [vmem:[%s4192_s30 + $0x518] sm:$0xff] %v529_v35  ;;  %v533_v37 = vld [vmem:[%s4187_s29 + $0xa48] sm:$0xff]  ;;  %v535_v38 = vld [vmem:[%s4187_s29 + $0xa50] sm:$0xff] }
  0x64   : > { %532 = vst [vmem:[%s4192_s30 + $0x520] sm:$0xff] %v531_v36  ;;  %v537_v39 = vld [vmem:[%s4187_s29 + $0xa58] sm:$0xff]  ;;  %534 = vst [vmem:[%s4192_s30 + $0x528] sm:$0xff] %v533_v37  ;;  %v539_v40 = vld [vmem:[%s4187_s29 + $0xa80] sm:$0xff] }
  0x65   : > { %536 = vst [vmem:[%s4192_s30 + $0x530] sm:$0xff] %v535_v38  ;;  %538 = vst [vmem:[%s4192_s30 + $0x538] sm:$0xff] %v537_v39  ;;  %v541_v41 = vld [vmem:[%s4187_s29 + $0xa88] sm:$0xff]  ;;  %v543_v42 = vld [vmem:[%s4187_s29 + $0xa90] sm:$0xff] }
  0x66   : > { %540 = vst [vmem:[%s4192_s30 + $0x540] sm:$0xff] %v539_v40  ;;  %542 = vst [vmem:[%s4192_s30 + $0x548] sm:$0xff] %v541_v41  ;;  %v545_v43 = vld [vmem:[%s4187_s29 + $0xa98] sm:$0xff]  ;;  %v547_v44 = vld [vmem:[%s4187_s29 + $0xac0] sm:$0xff] }
  0x67   : > { %544 = vst [vmem:[%s4192_s30 + $0x550] sm:$0xff] %v543_v42  ;;  %v549_v45 = vld [vmem:[%s4187_s29 + $0xac8] sm:$0xff]  ;;  %546 = vst [vmem:[%s4192_s30 + $0x558] sm:$0xff] %v545_v43  ;;  %v551_v46 = vld [vmem:[%s4187_s29 + $0xad0] sm:$0xff] }
  0x68   : > { %548 = vst [vmem:[%s4192_s30 + $0x560] sm:$0xff] %v547_v44  ;;  %550 = vst [vmem:[%s4192_s30 + $0x568] sm:$0xff] %v549_v45  ;;  %v553_v47 = vld [vmem:[%s4187_s29 + $0xad8] sm:$0xff]  ;;  %v555_v48 = vld [vmem:[%s4187_s29 + $0xb00] sm:$0xff] }
  0x69   : > { %552 = vst [vmem:[%s4192_s30 + $0x570] sm:$0xff] %v551_v46  ;;  %554 = vst [vmem:[%s4192_s30 + $0x578] sm:$0xff] %v553_v47  ;;  %v557_v49 = vld [vmem:[%s4187_s29 + $0xb08] sm:$0xff]  ;;  %v559_v50 = vld [vmem:[%s4187_s29 + $0xb10] sm:$0xff] }
  0x6a   : > { %556 = vst [vmem:[%s4192_s30 + $0x580] sm:$0xff] %v555_v48  ;;  %v561_v51 = vld [vmem:[%s4187_s29 + $0xb18] sm:$0xff]  ;;  %558 = vst [vmem:[%s4192_s30 + $0x588] sm:$0xff] %v557_v49  ;;  %v563_v52 = vld [vmem:[%s4187_s29 + $0xb40] sm:$0xff] }
  0x6b   : > { %560 = vst [vmem:[%s4192_s30 + $0x590] sm:$0xff] %v559_v50  ;;  %562 = vst [vmem:[%s4192_s30 + $0x598] sm:$0xff] %v561_v51  ;;  %v565_v53 = vld [vmem:[%s4187_s29 + $0xb48] sm:$0xff]  ;;  %v567_v54 = vld [vmem:[%s4187_s29 + $0xb50] sm:$0xff] }
  0x6c   : > { %564 = vst [vmem:[%s4192_s30 + $0x5a0] sm:$0xff] %v563_v52  ;;  %566 = vst [vmem:[%s4192_s30 + $0x5a8] sm:$0xff] %v565_v53  ;;  %v569_v55 = vld [vmem:[%s4187_s29 + $0xb58] sm:$0xff]  ;;  %v571_v56 = vld [vmem:[%s4187_s29 + $0xb80] sm:$0xff] }
  0x6d   : > { %568 = vst [vmem:[%s4192_s30 + $0x5b0] sm:$0xff] %v567_v54  ;;  %v573_v57 = vld [vmem:[%s4187_s29 + $0xb88] sm:$0xff]  ;;  %570 = vst [vmem:[%s4192_s30 + $0x5b8] sm:$0xff] %v569_v55  ;;  %v575_v58 = vld [vmem:[%s4187_s29 + $0xb90] sm:$0xff] }
  0x6e   : > { %572 = vst [vmem:[%s4192_s30 + $0x5c0] sm:$0xff] %v571_v56  ;;  %574 = vst [vmem:[%s4192_s30 + $0x5c8] sm:$0xff] %v573_v57  ;;  %v577_v59 = vld [vmem:[%s4187_s29 + $0xb98] sm:$0xff]  ;;  %v579_v60 = vld [vmem:[%s4187_s29 + $0xbc0] sm:$0xff] }
  0x6f   : > { %576 = vst [vmem:[%s4192_s30 + $0x5d0] sm:$0xff] %v575_v58  ;;  %578 = vst [vmem:[%s4192_s30 + $0x5d8] sm:$0xff] %v577_v59  ;;  %v581_v61 = vld [vmem:[%s4187_s29 + $0xbc8] sm:$0xff]  ;;  %v583_v62 = vld [vmem:[%s4187_s29 + $0xbd0] sm:$0xff] }
  0x70   : > { %580 = vst [vmem:[%s4192_s30 + $0x5e0] sm:$0xff] %v579_v60  ;;  %v585_v63 = vld [vmem:[%s4187_s29 + $0xbd8] sm:$0xff]  ;;  %582 = vst [vmem:[%s4192_s30 + $0x5e8] sm:$0xff] %v581_v61  ;;  %v587_v0 = vld [vmem:[%s4187_s29 + $0xc00] sm:$0xff] }
  0x71   : > { %584 = vst [vmem:[%s4192_s30 + $0x5f0] sm:$0xff] %v583_v62  ;;  %586 = vst [vmem:[%s4192_s30 + $0x5f8] sm:$0xff] %v585_v63  ;;  %v589_v1 = vld [vmem:[%s4187_s29 + $0xc08] sm:$0xff]  ;;  %v591_v2 = vld [vmem:[%s4187_s29 + $0xc10] sm:$0xff] }
  0x72   : > { %588 = vst [vmem:[%s4192_s30 + $0x600] sm:$0xff] %v587_v0  ;;  %590 = vst [vmem:[%s4192_s30 + $0x608] sm:$0xff] %v589_v1  ;;  %v593_v3 = vld [vmem:[%s4187_s29 + $0xc18] sm:$0xff]  ;;  %v595_v4 = vld [vmem:[%s4187_s29 + $0xc40] sm:$0xff] }
  0x73   : > { %592 = vst [vmem:[%s4192_s30 + $0x610] sm:$0xff] %v591_v2  ;;  %v597_v5 = vld [vmem:[%s4187_s29 + $0xc48] sm:$0xff]  ;;  %594 = vst [vmem:[%s4192_s30 + $0x618] sm:$0xff] %v593_v3  ;;  %v599_v6 = vld [vmem:[%s4187_s29 + $0xc50] sm:$0xff] }
  0x74   : > { %596 = vst [vmem:[%s4192_s30 + $0x620] sm:$0xff] %v595_v4  ;;  %598 = vst [vmem:[%s4192_s30 + $0x628] sm:$0xff] %v597_v5  ;;  %v601_v7 = vld [vmem:[%s4187_s29 + $0xc58] sm:$0xff]  ;;  %v603_v8 = vld [vmem:[%s4187_s29 + $0xc80] sm:$0xff] }
  0x75   : > { %600 = vst [vmem:[%s4192_s30 + $0x630] sm:$0xff] %v599_v6  ;;  %602 = vst [vmem:[%s4192_s30 + $0x638] sm:$0xff] %v601_v7  ;;  %v605_v9 = vld [vmem:[%s4187_s29 + $0xc88] sm:$0xff]  ;;  %v607_v10 = vld [vmem:[%s4187_s29 + $0xc90] sm:$0xff] }
  0x76   : > { %604 = vst [vmem:[%s4192_s30 + $0x640] sm:$0xff] %v603_v8  ;;  %v609_v11 = vld [vmem:[%s4187_s29 + $0xc98] sm:$0xff]  ;;  %606 = vst [vmem:[%s4192_s30 + $0x648] sm:$0xff] %v605_v9  ;;  %v611_v12 = vld [vmem:[%s4187_s29 + $0xcc0] sm:$0xff] }
  0x77   : > { %608 = vst [vmem:[%s4192_s30 + $0x650] sm:$0xff] %v607_v10  ;;  %610 = vst [vmem:[%s4192_s30 + $0x658] sm:$0xff] %v609_v11  ;;  %v613_v13 = vld [vmem:[%s4187_s29 + $0xcc8] sm:$0xff]  ;;  %v615_v14 = vld [vmem:[%s4187_s29 + $0xcd0] sm:$0xff] }
  0x78   : > { %612 = vst [vmem:[%s4192_s30 + $0x660] sm:$0xff] %v611_v12  ;;  %614 = vst [vmem:[%s4192_s30 + $0x668] sm:$0xff] %v613_v13  ;;  %v617_v15 = vld [vmem:[%s4187_s29 + $0xcd8] sm:$0xff]  ;;  %v619_v16 = vld [vmem:[%s4187_s29 + $0xd00] sm:$0xff] }
  0x79   : > { %616 = vst [vmem:[%s4192_s30 + $0x670] sm:$0xff] %v615_v14  ;;  %v621_v17 = vld [vmem:[%s4187_s29 + $0xd08] sm:$0xff]  ;;  %618 = vst [vmem:[%s4192_s30 + $0x678] sm:$0xff] %v617_v15  ;;  %v623_v18 = vld [vmem:[%s4187_s29 + $0xd10] sm:$0xff] }
  0x7a   : > { %620 = vst [vmem:[%s4192_s30 + $0x680] sm:$0xff] %v619_v16  ;;  %622 = vst [vmem:[%s4192_s30 + $0x688] sm:$0xff] %v621_v17  ;;  %v625_v19 = vld [vmem:[%s4187_s29 + $0xd18] sm:$0xff]  ;;  %v627_v20 = vld [vmem:[%s4187_s29 + $0xd40] sm:$0xff] }
  0x7b   : > { %624 = vst [vmem:[%s4192_s30 + $0x690] sm:$0xff] %v623_v18  ;;  %626 = vst [vmem:[%s4192_s30 + $0x698] sm:$0xff] %v625_v19  ;;  %v629_v21 = vld [vmem:[%s4187_s29 + $0xd48] sm:$0xff]  ;;  %v631_v22 = vld [vmem:[%s4187_s29 + $0xd50] sm:$0xff] }
  0x7c   : > { %628 = vst [vmem:[%s4192_s30 + $0x6a0] sm:$0xff] %v627_v20  ;;  %v633_v23 = vld [vmem:[%s4187_s29 + $0xd58] sm:$0xff]  ;;  %630 = vst [vmem:[%s4192_s30 + $0x6a8] sm:$0xff] %v629_v21  ;;  %v635_v24 = vld [vmem:[%s4187_s29 + $0xd80] sm:$0xff] }
  0x7d   : > { %632 = vst [vmem:[%s4192_s30 + $0x6b0] sm:$0xff] %v631_v22  ;;  %634 = vst [vmem:[%s4192_s30 + $0x6b8] sm:$0xff] %v633_v23  ;;  %v637_v25 = vld [vmem:[%s4187_s29 + $0xd88] sm:$0xff]  ;;  %v639_v26 = vld [vmem:[%s4187_s29 + $0xd90] sm:$0xff] }
  0x7e   : > { %636 = vst [vmem:[%s4192_s30 + $0x6c0] sm:$0xff] %v635_v24  ;;  %638 = vst [vmem:[%s4192_s30 + $0x6c8] sm:$0xff] %v637_v25  ;;  %v641_v27 = vld [vmem:[%s4187_s29 + $0xd98] sm:$0xff]  ;;  %v643_v28 = vld [vmem:[%s4187_s29 + $0xdc0] sm:$0xff] }
  0x7f   : > { %640 = vst [vmem:[%s4192_s30 + $0x6d0] sm:$0xff] %v639_v26  ;;  %v645_v29 = vld [vmem:[%s4187_s29 + $0xdc8] sm:$0xff]  ;;  %642 = vst [vmem:[%s4192_s30 + $0x6d8] sm:$0xff] %v641_v27  ;;  %v647_v30 = vld [vmem:[%s4187_s29 + $0xdd0] sm:$0xff] }
  0x80   : > { %644 = vst [vmem:[%s4192_s30 + $0x6e0] sm:$0xff] %v643_v28  ;;  %646 = vst [vmem:[%s4192_s30 + $0x6e8] sm:$0xff] %v645_v29  ;;  %v649_v31 = vld [vmem:[%s4187_s29 + $0xdd8] sm:$0xff]  ;;  %v651_v32 = vld [vmem:[%s4187_s29 + $0xe00] sm:$0xff] }
  0x81   : > { %648 = vst [vmem:[%s4192_s30 + $0x6f0] sm:$0xff] %v647_v30  ;;  %650 = vst [vmem:[%s4192_s30 + $0x6f8] sm:$0xff] %v649_v31  ;;  %v653_v33 = vld [vmem:[%s4187_s29 + $0xe08] sm:$0xff]  ;;  %v655_v34 = vld [vmem:[%s4187_s29 + $0xe10] sm:$0xff] }
  0x82   : > { %652 = vst [vmem:[%s4192_s30 + $0x700] sm:$0xff] %v651_v32  ;;  %v657_v35 = vld [vmem:[%s4187_s29 + $0xe18] sm:$0xff]  ;;  %654 = vst [vmem:[%s4192_s30 + $0x708] sm:$0xff] %v653_v33  ;;  %v659_v36 = vld [vmem:[%s4187_s29 + $0xe40] sm:$0xff] }
  0x83   : > { %656 = vst [vmem:[%s4192_s30 + $0x710] sm:$0xff] %v655_v34  ;;  %658 = vst [vmem:[%s4192_s30 + $0x718] sm:$0xff] %v657_v35  ;;  %v661_v37 = vld [vmem:[%s4187_s29 + $0xe48] sm:$0xff]  ;;  %v663_v38 = vld [vmem:[%s4187_s29 + $0xe50] sm:$0xff] }
  0x84   : > { %660 = vst [vmem:[%s4192_s30 + $0x720] sm:$0xff] %v659_v36  ;;  %662 = vst [vmem:[%s4192_s30 + $0x728] sm:$0xff] %v661_v37  ;;  %v665_v39 = vld [vmem:[%s4187_s29 + $0xe58] sm:$0xff]  ;;  %v667_v40 = vld [vmem:[%s4187_s29 + $0xe80] sm:$0xff] }
  0x85   : > { %664 = vst [vmem:[%s4192_s30 + $0x730] sm:$0xff] %v663_v38  ;;  %v669_v41 = vld [vmem:[%s4187_s29 + $0xe88] sm:$0xff]  ;;  %666 = vst [vmem:[%s4192_s30 + $0x738] sm:$0xff] %v665_v39  ;;  %v671_v42 = vld [vmem:[%s4187_s29 + $0xe90] sm:$0xff] }
  0x86   : > { %668 = vst [vmem:[%s4192_s30 + $0x740] sm:$0xff] %v667_v40  ;;  %670 = vst [vmem:[%s4192_s30 + $0x748] sm:$0xff] %v669_v41  ;;  %v673_v43 = vld [vmem:[%s4187_s29 + $0xe98] sm:$0xff]  ;;  %v675_v44 = vld [vmem:[%s4187_s29 + $0xec0] sm:$0xff] }
  0x87   : > { %672 = vst [vmem:[%s4192_s30 + $0x750] sm:$0xff] %v671_v42  ;;  %674 = vst [vmem:[%s4192_s30 + $0x758] sm:$0xff] %v673_v43  ;;  %v677_v45 = vld [vmem:[%s4187_s29 + $0xec8] sm:$0xff]  ;;  %v679_v46 = vld [vmem:[%s4187_s29 + $0xed0] sm:$0xff] }
  0x88   : > { %676 = vst [vmem:[%s4192_s30 + $0x760] sm:$0xff] %v675_v44  ;;  %v681_v47 = vld [vmem:[%s4187_s29 + $0xed8] sm:$0xff]  ;;  %678 = vst [vmem:[%s4192_s30 + $0x768] sm:$0xff] %v677_v45  ;;  %v683_v48 = vld [vmem:[%s4187_s29 + $0xf00] sm:$0xff] }
  0x89   : > { %680 = vst [vmem:[%s4192_s30 + $0x770] sm:$0xff] %v679_v46  ;;  %682 = vst [vmem:[%s4192_s30 + $0x778] sm:$0xff] %v681_v47  ;;  %v685_v49 = vld [vmem:[%s4187_s29 + $0xf08] sm:$0xff]  ;;  %v687_v50 = vld [vmem:[%s4187_s29 + $0xf10] sm:$0xff] }
  0x8a   : > { %684 = vst [vmem:[%s4192_s30 + $0x780] sm:$0xff] %v683_v48  ;;  %686 = vst [vmem:[%s4192_s30 + $0x788] sm:$0xff] %v685_v49  ;;  %v689_v51 = vld [vmem:[%s4187_s29 + $0xf18] sm:$0xff]  ;;  %v691_v52 = vld [vmem:[%s4187_s29 + $0xf40] sm:$0xff] }
  0x8b   : > { %688 = vst [vmem:[%s4192_s30 + $0x790] sm:$0xff] %v687_v50  ;;  %v693_v53 = vld [vmem:[%s4187_s29 + $0xf48] sm:$0xff]  ;;  %690 = vst [vmem:[%s4192_s30 + $0x798] sm:$0xff] %v689_v51  ;;  %v695_v54 = vld [vmem:[%s4187_s29 + $0xf50] sm:$0xff] }
  0x8c   : > { %692 = vst [vmem:[%s4192_s30 + $0x7a0] sm:$0xff] %v691_v52  ;;  %694 = vst [vmem:[%s4192_s30 + $0x7a8] sm:$0xff] %v693_v53  ;;  %v697_v55 = vld [vmem:[%s4187_s29 + $0xf58] sm:$0xff]  ;;  %v699_v56 = vld [vmem:[%s4187_s29 + $0xf80] sm:$0xff] }
  0x8d   : > { %696 = vst [vmem:[%s4192_s30 + $0x7b0] sm:$0xff] %v695_v54  ;;  %698 = vst [vmem:[%s4192_s30 + $0x7b8] sm:$0xff] %v697_v55  ;;  %v701_v57 = vld [vmem:[%s4187_s29 + $0xf88] sm:$0xff]  ;;  %v703_v58 = vld [vmem:[%s4187_s29 + $0xf90] sm:$0xff] }
  0x8e   : > { %700 = vst [vmem:[%s4192_s30 + $0x7c0] sm:$0xff] %v699_v56  ;;  %v705_v59 = vld [vmem:[%s4187_s29 + $0xf98] sm:$0xff]  ;;  %702 = vst [vmem:[%s4192_s30 + $0x7c8] sm:$0xff] %v701_v57  ;;  %v707_v60 = vld [vmem:[%s4187_s29 + $0xfc0] sm:$0xff] }
  0x8f   : > { %704 = vst [vmem:[%s4192_s30 + $0x7d0] sm:$0xff] %v703_v58  ;;  %706 = vst [vmem:[%s4192_s30 + $0x7d8] sm:$0xff] %v705_v59  ;;  %v709_v61 = vld [vmem:[%s4187_s29 + $0xfc8] sm:$0xff]  ;;  %v711_v62 = vld [vmem:[%s4187_s29 + $0xfd0] sm:$0xff] }
  0x90   : > { %708 = vst [vmem:[%s4192_s30 + $0x7e0] sm:$0xff] %v707_v60  ;;  %710 = vst [vmem:[%s4192_s30 + $0x7e8] sm:$0xff] %v709_v61  ;;  %v713_v63 = vld [vmem:[%s4187_s29 + $0xfd8] sm:$0xff] }
  0x91   : > { %712 = vst [vmem:[%s4192_s30 + $0x7f0] sm:$0xff] %v711_v62  ;;  %714 = vst [vmem:[%s4192_s30 + $0x7f8] sm:$0xff] %v713_v63 }
  0x92 PF: > { %p3534_p6 = scmp.ge.s32.totalorder %s4117_s19, 1  ;;  %p736_p7 = scmp.lt.s32.totalorder %s4117_s19, 3 }
  0x94   : > { %p737_p8 = pnand %p3534_p6, %p736_p7 }
  0x95   : > { %s743_s5 = sand.u32 (!%p737_p8), 1, %s4101_s15   ;;  %v810_v0 = vld [vmem:[%s5114_s0 + $0x8] sm:$0xff] (!%p737_p8)  ;;  %s3537_s21 = sshll.u32 (!%p737_p8), %s4109_s17, 7 }
  0x96   : > { %740 = sbr.rel (%p737_p8) target bundleno = 852 (0x354), region = 55  ;;  %s3535_s8 = sshll.u32 (!%p737_p8), %s743_s5, 11  ;;  %v4709_v1 = vpack.c.bf16 (!%p737_p8), %v810_v0, %v810_v0 }
  0x97   : > { %s4711_s9 = scalar_lea.vmem (!%p737_p8), [#allocation2], %s3535_s8  ;;  %p796_p9 = scmp.lt.s32.totalorder (!%p737_p8), %s3537_s21, 255 }
  0x98   : > { %v817_v2 = vld [vmem:[%s4711_s9] sm:$0xff] (!%p737_p8)  ;;  %v818_v4 = vld [vmem:[%s4711_s9 + $0x8] sm:$0xff] (!%p737_p8)  ;;  %2427 = vmatprep.mubr.bf16.mxu0 (!%p737_p8), %v4709_v1  ;;  %2509 = vmatprep.mubr.bf16.mxu1 (!%p737_p8), %v4709_v1  ;;  %s3536_s27 = sshll.u32 (!%p737_p8), %s4109_s17, 3  ;;  %p801_p11 = scmp.lt.s32.totalorder (!%p737_p8), %s4109_s17, 1 }
  0x99   : > { %v821_v3 = vld [vmem:[%s4711_s9 + $0x20] sm:$0xff] (!%p737_p8)  ;;  %v822_v6 = vld [vmem:[%s4711_s9 + $0x28] sm:$0xff] (!%p737_p8)  ;;  %p791_p10 = scmp.lt.s32.totalorder (!%p737_p8), %s3536_s27, 15 }
  0x9a   : > { %v3541_v5 = vcombine.high (!%p737_p8), %v817_v2, %v821_v3  ;;  %v3540_v7 = vcombine.low (!%p737_p8), %v817_v2, %v821_v3  ;;  %v825_v8 = vld [vmem:[%s4711_s9 + $0x40] sm:$0xff] (!%p737_p8)  ;;  %v3543_v10 = vcombine.high (!%p737_p8), %v818_v4, %v822_v6  ;;  %v3542_v11 = vcombine.low (!%p737_p8), %v818_v4, %v822_v6  ;;  %v826_v13 = vld [vmem:[%s4711_s9 + $0x48] sm:$0xff] (!%p737_p8) }
  0x9b   : > { %v829_v9 = vld [vmem:[%s4711_s9 + $0x60] sm:$0xff] (!%p737_p8)  ;;  %v830_v14 = vld [vmem:[%s4711_s9 + $0x68] sm:$0xff] (!%p737_p8) }
  0x9c   : > { %v3549_v12 = vcombine.high (!%p737_p8), %v825_v8, %v829_v9  ;;  %v833_v15 = vld [vmem:[%s4711_s9 + $0x80] sm:$0xff] (!%p737_p8)  ;;  %2395 = vmatprep.subr.bf16.mxu0 (!%p737_p8), %v3541_v5  ;;  %v3551_v16 = vcombine.high (!%p737_p8), %v826_v13, %v830_v14  ;;  %v834_v18 = vld [vmem:[%s4711_s9 + $0x88] sm:$0xff] (!%p737_p8)  ;;  %2477 = vmatprep.subr.bf16.mxu1 (!%p737_p8), %v3543_v10  ;;  %v3548_v20 = vcombine.low (!%p737_p8), %v825_v8, %v829_v9 }
  0x9d   : > { %v837_v17 = vld [vmem:[%s4711_s9 + $0xa0] sm:$0xff]  ;;  %v838_v19 = vld [vmem:[%s4711_s9 + $0xa8] sm:$0xff]  ;;  %2396 = vmatpush1.bf16.msra.mxu0 %v3540_v7  ;;  %2478 = vmatpush1.bf16.msra.mxu1 %v3542_v11  ;;  %v3550_v21 = vcombine.low %v826_v13, %v830_v14  ;;  %s5126_s21 = smov (!%p796_p9, %s3537_s21), 255  ;;  %s5128_s27 = smov (!%p791_p10, %s3536_s27), 15 }
  0x9e   : > { %2397 = vmatprep.subr.bf16.mxu0 %v3549_v12  ;;  %v3557_v22 = vcombine.high %v833_v15, %v837_v17  ;;  %2479 = vmatprep.subr.bf16.mxu1 %v3551_v16  ;;  %v3559_v23 = vcombine.high %v834_v18, %v838_v19  ;;  %v841_v24 = vld [vmem:[%s4711_s9 + $0xc0] sm:$0xff]  ;;  %v842_v26 = vld [vmem:[%s4711_s9 + $0xc8] sm:$0xff]  ;;  %v3556_v28 = vcombine.low %v833_v15, %v837_v17  ;;  %s3538_s22 = sshll.u32 %s5126_s21, 2  ;;  %s793_s30 = scalar_lea.vmem %s5116_s2, %s5128_s27 }
  0x9f   : > { %v845_v25 = vld [vmem:[%s4711_s9 + $0xe0] sm:$0xff]  ;;  %v846_v27 = vld [vmem:[%s4711_s9 + $0xe8] sm:$0xff]  ;;  %v3558_v29 = vcombine.low %v834_v18, %v838_v19  ;;  %s4889_s26 = scalar_lea.vmem %s5117_s3, %s3538_s22  ;;  %s5130_s17 = smov (!%p801_p11, %s4109_s17), 1 }
  0xa0   : > { %v3565_v30 = vcombine.high %v841_v24, %v845_v25  ;;  %v3567_v31 = vcombine.high %v842_v26, %v846_v27  ;;  %v849_v32 = vld [vmem:[%s4711_s9 + $0x100] sm:$0xff]  ;;  %v850_v34 = vld [vmem:[%s4711_s9 + $0x108] sm:$0xff]  ;;  %v3564_v36 = vcombine.low %v841_v24, %v845_v25  ;;  %v3566_v37 = vcombine.low %v842_v26, %v846_v27  ;;  %s3539_s5 = sshll.u32 %s5130_s17, 3 }
  0xa1   : > { %2398 = vmatpush1.bf16.msra.mxu0 %v3548_v20  ;;  %2480 = vmatpush1.bf16.msra.mxu1 %v3550_v21  ;;  %v853_v33 = vld [vmem:[%s4711_s9 + $0x120] sm:$0xff]  ;;  %v854_v35 = vld [vmem:[%s4711_s9 + $0x128] sm:$0xff]  ;;  %s807_s8 = scalar_lea.vmem %s5118_s4, %s3539_s5 }
  0xa2   : > { %2399 = vmatprep.subr.bf16.mxu0 %v3557_v22  ;;  %2481 = vmatprep.subr.bf16.mxu1 %v3559_v23  ;;  %v3573_v38 = vcombine.high %v849_v32, %v853_v33  ;;  %v3575_v39 = vcombine.high %v850_v34, %v854_v35  ;;  %v857_v40 = vld [vmem:[%s4711_s9 + $0x140] sm:$0xff]  ;;  %v858_v42 = vld [vmem:[%s4711_s9 + $0x148] sm:$0xff]  ;;  %v3572_v44 = vcombine.low %v849_v32, %v853_v33 }
  0xa3   : > { %v861_v41 = vld [vmem:[%s4711_s9 + $0x160] sm:$0xff]  ;;  %v862_v43 = vld [vmem:[%s4711_s9 + $0x168] sm:$0xff]  ;;  %v3574_v45 = vcombine.low %v850_v34, %v854_v35 }
  0xa4   : > { %v3581_v46 = vcombine.high %v857_v40, %v861_v41  ;;  %v3583_v47 = vcombine.high %v858_v42, %v862_v43  ;;  %v865_v48 = vld [vmem:[%s4711_s9 + $0x180] sm:$0xff]  ;;  %v866_v50 = vld [vmem:[%s4711_s9 + $0x188] sm:$0xff]  ;;  %v3580_v52 = vcombine.low %v857_v40, %v861_v41  ;;  %v3582_v53 = vcombine.low %v858_v42, %v862_v43 }
  0xa5   : > { %2400 = vmatpush1.bf16.msra.mxu0 %v3556_v28  ;;  %2482 = vmatpush1.bf16.msra.mxu1 %v3558_v29  ;;  %v869_v49 = vld [vmem:[%s4711_s9 + $0x1a0] sm:$0xff]  ;;  %v870_v51 = vld [vmem:[%s4711_s9 + $0x1a8] sm:$0xff] }
  0xa6   : > { %2401 = vmatprep.subr.bf16.mxu0 %v3565_v30  ;;  %2483 = vmatprep.subr.bf16.mxu1 %v3567_v31  ;;  %v3589_v54 = vcombine.high %v865_v48, %v869_v49  ;;  %v3591_v55 = vcombine.high %v866_v50, %v870_v51  ;;  %v873_v56 = vld [vmem:[%s4711_s9 + $0x1c0] sm:$0xff]  ;;  %v874_v58 = vld [vmem:[%s4711_s9 + $0x1c8] sm:$0xff]  ;;  %v3588_v60 = vcombine.low %v865_v48, %v869_v49 }
  0xa7   : > { %v877_v57 = vld [vmem:[%s4711_s9 + $0x1e0] sm:$0xff]  ;;  %v878_v59 = vld [vmem:[%s4711_s9 + $0x1e8] sm:$0xff]  ;;  %v3590_v61 = vcombine.low %v866_v50, %v870_v51 }
  0xa8   : > { %v3597_v62 = vcombine.high %v873_v56, %v877_v57  ;;  %v3599_v63 = vcombine.high %v874_v58, %v878_v59  ;;  %v881_v0 = vld [vmem:[%s4711_s9 + $0x200] sm:$0xff]  ;;  %v882_v3 = vld [vmem:[%s4711_s9 + $0x208] sm:$0xff]  ;;  %v3596_v5 = vcombine.low %v873_v56, %v877_v57  ;;  %v3598_v6 = vcombine.low %v874_v58, %v878_v59 }
  0xa9   : > { %2402 = vmatpush1.bf16.msra.mxu0 %v3564_v36  ;;  %2484 = vmatpush1.bf16.msra.mxu1 %v3566_v37  ;;  %v885_v2 = vld [vmem:[%s4711_s9 + $0x220] sm:$0xff]  ;;  %v886_v4 = vld [vmem:[%s4711_s9 + $0x228] sm:$0xff] }
  0xaa   : > { %2403 = vmatprep.subr.bf16.mxu0 %v3573_v38  ;;  %2485 = vmatprep.subr.bf16.mxu1 %v3575_v39  ;;  %v3605_v7 = vcombine.high %v881_v0, %v885_v2  ;;  %v3607_v8 = vcombine.high %v882_v3, %v886_v4  ;;  %v889_v9 = vld [vmem:[%s4711_s9 + $0x240] sm:$0xff]  ;;  %v890_v11 = vld [vmem:[%s4711_s9 + $0x248] sm:$0xff]  ;;  %v3604_v13 = vcombine.low %v881_v0, %v885_v2 }
  0xab   : > { %v893_v10 = vld [vmem:[%s4711_s9 + $0x260] sm:$0xff]  ;;  %v894_v12 = vld [vmem:[%s4711_s9 + $0x268] sm:$0xff]  ;;  %v3606_v14 = vcombine.low %v882_v3, %v886_v4 }
  0xac   : > { %v3613_v15 = vcombine.high %v889_v9, %v893_v10  ;;  %v3615_v16 = vcombine.high %v890_v11, %v894_v12  ;;  %v897_v17 = vld [vmem:[%s4711_s9 + $0x280] sm:$0xff]  ;;  %v898_v19 = vld [vmem:[%s4711_s9 + $0x288] sm:$0xff]  ;;  %v3612_v21 = vcombine.low %v889_v9, %v893_v10  ;;  %v3614_v22 = vcombine.low %v890_v11, %v894_v12 }
  0xad   : > { %2404 = vmatpush1.bf16.msra.mxu0 %v3572_v44  ;;  %2486 = vmatpush1.bf16.msra.mxu1 %v3574_v45  ;;  %v901_v18 = vld [vmem:[%s4711_s9 + $0x2a0] sm:$0xff]  ;;  %v902_v20 = vld [vmem:[%s4711_s9 + $0x2a8] sm:$0xff] }
  0xae   : > { %2405 = vmatprep.subr.bf16.mxu0 %v3581_v46  ;;  %2487 = vmatprep.subr.bf16.mxu1 %v3583_v47  ;;  %v3621_v23 = vcombine.high %v897_v17, %v901_v18  ;;  %v3623_v24 = vcombine.high %v898_v19, %v902_v20  ;;  %v905_v25 = vld [vmem:[%s4711_s9 + $0x2c0] sm:$0xff]  ;;  %v906_v27 = vld [vmem:[%s4711_s9 + $0x2c8] sm:$0xff]  ;;  %v3620_v29 = vcombine.low %v897_v17, %v901_v18 }
  0xaf   : > { %v909_v26 = vld [vmem:[%s4711_s9 + $0x2e0] sm:$0xff]  ;;  %v910_v28 = vld [vmem:[%s4711_s9 + $0x2e8] sm:$0xff]  ;;  %v3622_v30 = vcombine.low %v898_v19, %v902_v20 }
  0xb0   : > { %v3629_v31 = vcombine.high %v905_v25, %v909_v26  ;;  %v3631_v32 = vcombine.high %v906_v27, %v910_v28  ;;  %v913_v33 = vld [vmem:[%s4711_s9 + $0x300] sm:$0xff]  ;;  %v914_v35 = vld [vmem:[%s4711_s9 + $0x308] sm:$0xff]  ;;  %v3628_v37 = vcombine.low %v905_v25, %v909_v26  ;;  %v3630_v38 = vcombine.low %v906_v27, %v910_v28 }
  0xb1   : > { %2406 = vmatpush1.bf16.msra.mxu0 %v3580_v52  ;;  %2488 = vmatpush1.bf16.msra.mxu1 %v3582_v53  ;;  %v917_v34 = vld [vmem:[%s4711_s9 + $0x320] sm:$0xff]  ;;  %v918_v36 = vld [vmem:[%s4711_s9 + $0x328] sm:$0xff] }
  0xb2   : > { %2407 = vmatprep.subr.bf16.mxu0 %v3589_v54  ;;  %2489 = vmatprep.subr.bf16.mxu1 %v3591_v55  ;;  %v3637_v39 = vcombine.high %v913_v33, %v917_v34  ;;  %v3639_v40 = vcombine.high %v914_v35, %v918_v36  ;;  %v921_v41 = vld [vmem:[%s4711_s9 + $0x340] sm:$0xff]  ;;  %v922_v43 = vld [vmem:[%s4711_s9 + $0x348] sm:$0xff]  ;;  %v3636_v45 = vcombine.low %v913_v33, %v917_v34 }
  0xb3   : > { %v925_v42 = vld [vmem:[%s4711_s9 + $0x360] sm:$0xff]  ;;  %v926_v44 = vld [vmem:[%s4711_s9 + $0x368] sm:$0xff]  ;;  %v3638_v46 = vcombine.low %v914_v35, %v918_v36 }
  0xb4   : > { %v3645_v47 = vcombine.high %v921_v41, %v925_v42  ;;  %v3647_v48 = vcombine.high %v922_v43, %v926_v44  ;;  %v929_v49 = vld [vmem:[%s4711_s9 + $0x380] sm:$0xff]  ;;  %v930_v51 = vld [vmem:[%s4711_s9 + $0x388] sm:$0xff]  ;;  %v3644_v53 = vcombine.low %v921_v41, %v925_v42  ;;  %v3646_v54 = vcombine.low %v922_v43, %v926_v44 }
  0xb5   : > { %2408 = vmatpush1.bf16.msra.mxu0 %v3588_v60  ;;  %2490 = vmatpush1.bf16.msra.mxu1 %v3590_v61  ;;  %v933_v50 = vld [vmem:[%s4711_s9 + $0x3a0] sm:$0xff]  ;;  %v934_v52 = vld [vmem:[%s4711_s9 + $0x3a8] sm:$0xff] }
  0xb6   : > { %2409 = vmatprep.subr.bf16.mxu0 %v3597_v62  ;;  %2491 = vmatprep.subr.bf16.mxu1 %v3599_v63  ;;  %v3653_v55 = vcombine.high %v929_v49, %v933_v50  ;;  %v3655_v56 = vcombine.high %v930_v51, %v934_v52  ;;  %v937_v57 = vld [vmem:[%s4711_s9 + $0x3c0] sm:$0xff]  ;;  %v938_v59 = vld [vmem:[%s4711_s9 + $0x3c8] sm:$0xff]  ;;  %v3652_v61 = vcombine.low %v929_v49, %v933_v50 }
  0xb7   : > { %v941_v58 = vld [vmem:[%s4711_s9 + $0x3e0] sm:$0xff]  ;;  %v942_v60 = vld [vmem:[%s4711_s9 + $0x3e8] sm:$0xff]  ;;  %v3654_v62 = vcombine.low %v930_v51, %v934_v52 }
  0xb8   : > { %v3661_v63 = vcombine.high %v937_v57, %v941_v58  ;;  %v3663_v0 = vcombine.high %v938_v59, %v942_v60  ;;  %v945_v2 = vld [vmem:[%s4711_s9 + $0x400] sm:$0xff]  ;;  %v946_v4 = vld [vmem:[%s4711_s9 + $0x408] sm:$0xff] }
  0xb9   : > { %2410 = vmatpush1.bf16.msra.mxu0 %v3596_v5  ;;  %2492 = vmatpush1.bf16.msra.mxu1 %v3598_v6  ;;  %v949_v3 = vld [vmem:[%s4711_s9 + $0x420] sm:$0xff]  ;;  %v950_v5 = vld [vmem:[%s4711_s9 + $0x428] sm:$0xff]  ;;  %v3660_v6 = vcombine.low %v937_v57, %v941_v58 }
  0xba   : > { %2411 = vmatprep.subr.bf16.mxu0 %v3605_v7  ;;  %2493 = vmatprep.subr.bf16.mxu1 %v3607_v8  ;;  %v809_v7 = vld [vmem:[%s5114_s0] sm:$0xff]  ;;  %v3662_v8 = vcombine.low %v938_v59, %v942_v60  ;;  %v3669_v9 = vcombine.high %v945_v2, %v949_v3  ;;  %v3671_v10 = vcombine.high %v946_v4, %v950_v5  ;;  %v966_v25 = vld [vmem:[%s4711_s9 + $0x4a8] sm:$0xff] }
  0xbb   : > { %v953_v11 = vld [vmem:[%s4711_s9 + $0x440] sm:$0xff]  ;;  %v3668_v17 = vcombine.low %v945_v2, %v949_v3  ;;  %v3670_v18 = vcombine.low %v946_v4, %v950_v5  ;;  %v974_v33 = vld [vmem:[%s4711_s9 + $0x4e8] sm:$0xff] }
  0xbc   : > { %v957_v12 = vld [vmem:[%s4711_s9 + $0x460] sm:$0xff]  ;;  %v982_v41 = vld [vmem:[%s4711_s9 + $0x528] sm:$0xff] }
  0xbd   : > { %2412 = vmatpush1.bf16.msra.mxu0 %v3604_v13  ;;  %2494 = vmatpush1.bf16.msra.mxu1 %v3606_v14  ;;  %v4788_v13 = vpack.c.bf16 %v809_v7, %v809_v7  ;;  %v954_v14 = vld [vmem:[%s4711_s9 + $0x448] sm:$0xff]  ;;  %v3677_v19 = vcombine.high %v953_v11, %v957_v12  ;;  %v3676_v26 = vcombine.low %v953_v11, %v957_v12  ;;  %v1009_v7 = vld [vmem:[%s4711_s9 + $0x600] sm:$0xff] }
  0xbe   : > { %2413 = vmatprep.subr.bf16.mxu0 %v3613_v15  ;;  %2495 = vmatprep.subr.bf16.mxu1 %v3615_v16  ;;  %v958_v15 = vld [vmem:[%s4711_s9 + $0x468] sm:$0xff]  ;;  %v812_v16 = vld [vmem:[%s5114_s0 + $0x18] sm:$0xff] }
  0xbf   : > { %v3679_v20 = vcombine.high %v954_v14, %v958_v15  ;;  %v3678_v27 = vcombine.low %v954_v14, %v958_v15  ;;  %v990_v49 = vld [vmem:[%s4711_s9 + $0x568] sm:$0xff] }
  0xc0   : > { %v998_v57 = vld [vmem:[%s4711_s9 + $0x5a8] sm:$0xff] }
  0xc1   : > { %2414 = vmatpush1.bf16.msra.mxu0 %v3612_v21  ;;  %2496 = vmatpush1.bf16.msra.mxu1 %v3614_v22  ;;  %v961_v21 = vld [vmem:[%s4711_s9 + $0x480] sm:$0xff]  ;;  %v1006_v2 = vld [vmem:[%s4711_s9 + $0x5e8] sm:$0xff] }
  0xc2   : > { %2415 = vmatprep.subr.bf16.mxu0 %v3621_v23  ;;  %2497 = vmatprep.subr.bf16.mxu1 %v3623_v24  ;;  %v965_v22 = vld [vmem:[%s4711_s9 + $0x4a0] sm:$0xff]  ;;  %v4797_v23 = vpack.c.bf16 %v812_v16, %v812_v16  ;;  %v962_v24 = vld [vmem:[%s4711_s9 + $0x488] sm:$0xff] }
  0xc3   : > { %v3685_v28 = vcombine.high %v961_v21, %v965_v22  ;;  %v3684_v34 = vcombine.low %v961_v21, %v965_v22  ;;  %v3686_v35 = vcombine.low %v962_v24, %v966_v25  ;;  %v1017_v16 = vld [vmem:[%s4711_s9 + $0x640] sm:$0xff] }
  0xc5   : > { %2416 = vmatpush1.bf16.msra.mxu0 %v3620_v29  ;;  %2498 = vmatpush1.bf16.msra.mxu1 %v3622_v30  ;;  %v3687_v29 = vcombine.high %v962_v24, %v966_v25  ;;  %v969_v30 = vld [vmem:[%s4711_s9 + $0x4c0] sm:$0xff] }
  0xc6   : > { %2417 = vmatprep.subr.bf16.mxu0 %v3629_v31  ;;  %2499 = vmatprep.subr.bf16.mxu1 %v3631_v32  ;;  %v973_v31 = vld [vmem:[%s4711_s9 + $0x4e0] sm:$0xff]  ;;  %v970_v32 = vld [vmem:[%s4711_s9 + $0x4c8] sm:$0xff] }
  0xc7   : > { %v3693_v36 = vcombine.high %v969_v30, %v973_v31  ;;  %v3692_v42 = vcombine.low %v969_v30, %v973_v31  ;;  %v3694_v43 = vcombine.low %v970_v32, %v974_v33  ;;  %v1025_v25 = vld [vmem:[%s4711_s9 + $0x680] sm:$0xff] }
  0xc9   : > { %2418 = vmatpush1.bf16.msra.mxu0 %v3628_v37  ;;  %2500 = vmatpush1.bf16.msra.mxu1 %v3630_v38  ;;  %v3695_v37 = vcombine.high %v970_v32, %v974_v33  ;;  %v977_v38 = vld [vmem:[%s4711_s9 + $0x500] sm:$0xff] }
  0xca   : > { %2419 = vmatprep.subr.bf16.mxu0 %v3637_v39  ;;  %2501 = vmatprep.subr.bf16.mxu1 %v3639_v40  ;;  %v981_v39 = vld [vmem:[%s4711_s9 + $0x520] sm:$0xff]  ;;  %v978_v40 = vld [vmem:[%s4711_s9 + $0x508] sm:$0xff] }
  0xcb   : > { %v3701_v44 = vcombine.high %v977_v38, %v981_v39  ;;  %v3700_v50 = vcombine.low %v977_v38, %v981_v39  ;;  %v3702_v51 = vcombine.low %v978_v40, %v982_v41  ;;  %v1033_v33 = vld [vmem:[%s4711_s9 + $0x6c0] sm:$0xff] }
  0xcd   : > { %2420 = vmatpush1.bf16.msra.mxu0 %v3636_v45  ;;  %2502 = vmatpush1.bf16.msra.mxu1 %v3638_v46  ;;  %v3703_v45 = vcombine.high %v978_v40, %v982_v41  ;;  %v985_v46 = vld [vmem:[%s4711_s9 + $0x540] sm:$0xff] }
  0xce   : > { %2421 = vmatprep.subr.bf16.mxu0 %v3645_v47  ;;  %2503 = vmatprep.subr.bf16.mxu1 %v3647_v48  ;;  %v989_v47 = vld [vmem:[%s4711_s9 + $0x560] sm:$0xff]  ;;  %v986_v48 = vld [vmem:[%s4711_s9 + $0x548] sm:$0xff] }
  0xcf   : > { %v3709_v52 = vcombine.high %v985_v46, %v989_v47  ;;  %v3708_v58 = vcombine.low %v985_v46, %v989_v47  ;;  %v3710_v59 = vcombine.low %v986_v48, %v990_v49  ;;  %v1041_v41 = vld [vmem:[%s4711_s9 + $0x700] sm:$0xff] }
  0xd1   : > { %2422 = vmatpush1.bf16.msra.mxu0 %v3644_v53  ;;  %2504 = vmatpush1.bf16.msra.mxu1 %v3646_v54  ;;  %v3711_v53 = vcombine.high %v986_v48, %v990_v49  ;;  %v993_v54 = vld [vmem:[%s4711_s9 + $0x580] sm:$0xff] }
  0xd2   : > { %2423 = vmatprep.subr.bf16.mxu0 %v3653_v55  ;;  %2505 = vmatprep.subr.bf16.mxu1 %v3655_v56  ;;  %v997_v55 = vld [vmem:[%s4711_s9 + $0x5a0] sm:$0xff]  ;;  %v994_v56 = vld [vmem:[%s4711_s9 + $0x588] sm:$0xff] }
  0xd3   : > { %v3717_v60 = vcombine.high %v993_v54, %v997_v55  ;;  %v3716_v3 = vcombine.low %v993_v54, %v997_v55  ;;  %v3718_v4 = vcombine.low %v994_v56, %v998_v57  ;;  %v1049_v49 = vld [vmem:[%s4711_s9 + $0x740] sm:$0xff] }
  0xd5   : > { %2424 = vmatpush1.bf16.msra.mxu0 %v3652_v61  ;;  %2506 = vmatpush1.bf16.msra.mxu1 %v3654_v62  ;;  %v3719_v61 = vcombine.high %v994_v56, %v998_v57  ;;  %v1001_v62 = vld [vmem:[%s4711_s9 + $0x5c0] sm:$0xff] }
  0xd6   : > { %2425 = vmatprep.subr.bf16.mxu0 %v3661_v63  ;;  %2507 = vmatprep.subr.bf16.mxu1 %v3663_v0  ;;  %v1005_v63 = vld [vmem:[%s4711_s9 + $0x5e0] sm:$0xff]  ;;  %v1002_v0 = vld [vmem:[%s4711_s9 + $0x5c8] sm:$0xff] }
  0xd7   : > { %v3725_v5 = vcombine.high %v1001_v62, %v1005_v63  ;;  %v3724_v11 = vcombine.low %v1001_v62, %v1005_v63  ;;  %v3726_v12 = vcombine.low %v1002_v0, %v1006_v2  ;;  %v1057_v57 = vld [vmem:[%s4711_s9 + $0x780] sm:$0xff] }
  0xd9   : > { %2426 = vmatpush1.bf16.msra.mxu0 %v3660_v6  ;;  %2508 = vmatpush1.bf16.msra.mxu1 %v3662_v8  ;;  %v3727_v6 = vcombine.high %v1002_v0, %v1006_v2  ;;  %v1013_v8 = vld [vmem:[%s4711_s9 + $0x620] sm:$0xff] }
  0xda   : > { %2436 = vmatprep.subr.bf16.mxu0 %v3669_v9  ;;  %2518 = vmatprep.subr.bf16.mxu1 %v3671_v10  ;;  %v1010_v9 = vld [vmem:[%s4711_s9 + $0x608] sm:$0xff]  ;;  %v3733_v14 = vcombine.high %v1009_v7, %v1013_v8  ;;  %v1065_v2 = vld [vmem:[%s4711_s9 + $0x7c0] sm:$0xff] }
  0xdb   : > { %v1014_v10 = vld [vmem:[%s4711_s9 + $0x628] sm:$0xff] }
  0xdc   : > { %2428 = vmatmul.mubr.bf16.vlgmr.msra.gmra.mrb[0].mxu0 %v4788_v13  ;;  %2510 = vmatmul.mubr.bf16.vlgmr.msra.gmra.mrb[0].mxu1 %v4788_v13  ;;  %v3735_v15 = vcombine.high %v1010_v9, %v1014_v10  ;;  %v3734_v21 = vcombine.low %v1010_v9, %v1014_v10  ;;  %v819_v10 = vld [vmem:[%s4711_s9 + $0x10] sm:$0xff] }
  0xdd   : > { %2437 = vmatpush1.bf16.msra.mxu0 %v3668_v17  ;;  %2519 = vmatpush1.bf16.msra.mxu1 %v3670_v18  ;;  %v1021_v17 = vld [vmem:[%s4711_s9 + $0x660] sm:$0xff]  ;;  %v1018_v18 = vld [vmem:[%s4711_s9 + $0x648] sm:$0xff] }
  0xde   : > { %2438 = vmatprep.subr.bf16.mxu0 %v3677_v19  ;;  %2520 = vmatprep.subr.bf16.mxu1 %v3679_v20  ;;  %v1022_v19 = vld [vmem:[%s4711_s9 + $0x668] sm:$0xff]  ;;  %v3732_v20 = vcombine.low %v1009_v7, %v1013_v8  ;;  %v3741_v22 = vcombine.high %v1017_v16, %v1021_v17 }
  0xdf   : > { %2468 = vmatprep.mubr.bf16.mxu0 %v4797_v23  ;;  %2550 = vmatprep.mubr.bf16.mxu1 %v4797_v23  ;;  %v3743_v24 = vcombine.high %v1018_v18, %v1022_v19  ;;  %v3742_v30 = vcombine.low %v1018_v18, %v1022_v19 }
  0xe1   : > { %2439 = vmatpush1.bf16.msra.mxu0 %v3676_v26  ;;  %2521 = vmatpush1.bf16.msra.mxu1 %v3678_v27  ;;  %v1029_v26 = vld [vmem:[%s4711_s9 + $0x6a0] sm:$0xff]  ;;  %v1026_v27 = vld [vmem:[%s4711_s9 + $0x688] sm:$0xff] }
  0xe2   : > { %2440 = vmatprep.subr.bf16.mxu0 %v3685_v28  ;;  %2522 = vmatprep.subr.bf16.mxu1 %v3687_v29  ;;  %v1030_v28 = vld [vmem:[%s4711_s9 + $0x6a8] sm:$0xff]  ;;  %v3740_v29 = vcombine.low %v1017_v16, %v1021_v17  ;;  %v3749_v31 = vcombine.high %v1025_v25, %v1029_v26  ;;  %v811_v16 = vld [vmem:[%s5114_s0 + $0x10] sm:$0xff] }
  0xe3   : > { %v3751_v32 = vcombine.high %v1026_v27, %v1030_v28  ;;  %v3750_v38 = vcombine.low %v1026_v27, %v1030_v28 }
  0xe5   : > { %2441 = vmatpush1.bf16.msra.mxu0 %v3684_v34  ;;  %2523 = vmatpush1.bf16.msra.mxu1 %v3686_v35  ;;  %v1037_v34 = vld [vmem:[%s4711_s9 + $0x6e0] sm:$0xff]  ;;  %v1034_v35 = vld [vmem:[%s4711_s9 + $0x6c8] sm:$0xff] }
  0xe6   : > { %2442 = vmatprep.subr.bf16.mxu0 %v3693_v36  ;;  %2524 = vmatprep.subr.bf16.mxu1 %v3695_v37  ;;  %v1038_v36 = vld [vmem:[%s4711_s9 + $0x6e8] sm:$0xff]  ;;  %v3748_v37 = vcombine.low %v1025_v25, %v1029_v26  ;;  %v3757_v39 = vcombine.high %v1033_v33, %v1037_v34  ;;  %v832_v25 = vld [vmem:[%s4711_s9 + $0x78] sm:$0xff] }
  0xe7   : > { %v3759_v40 = vcombine.high %v1034_v35, %v1038_v36  ;;  %v3758_v46 = vcombine.low %v1034_v35, %v1038_v36 }
  0xe9   : > { %2443 = vmatpush1.bf16.msra.mxu0 %v3692_v42  ;;  %2525 = vmatpush1.bf16.msra.mxu1 %v3694_v43  ;;  %v1045_v42 = vld [vmem:[%s4711_s9 + $0x720] sm:$0xff]  ;;  %v1042_v43 = vld [vmem:[%s4711_s9 + $0x708] sm:$0xff] }
  0xea   : > { %2444 = vmatprep.subr.bf16.mxu0 %v3701_v44  ;;  %2526 = vmatprep.subr.bf16.mxu1 %v3703_v45  ;;  %v1046_v44 = vld [vmem:[%s4711_s9 + $0x728] sm:$0xff]  ;;  %v3756_v45 = vcombine.low %v1033_v33, %v1037_v34  ;;  %v3765_v47 = vcombine.high %v1041_v41, %v1045_v42  ;;  %v840_v33 = vld [vmem:[%s4711_s9 + $0xb8] sm:$0xff] }
  0xeb   : > { %v3767_v48 = vcombine.high %v1042_v43, %v1046_v44  ;;  %v3766_v54 = vcombine.low %v1042_v43, %v1046_v44 }
  0xed   : > { %2445 = vmatpush1.bf16.msra.mxu0 %v3700_v50  ;;  %2527 = vmatpush1.bf16.msra.mxu1 %v3702_v51  ;;  %v1053_v50 = vld [vmem:[%s4711_s9 + $0x760] sm:$0xff]  ;;  %v1050_v51 = vld [vmem:[%s4711_s9 + $0x748] sm:$0xff] }
  0xee   : > { %2446 = vmatprep.subr.bf16.mxu0 %v3709_v52  ;;  %2528 = vmatprep.subr.bf16.mxu1 %v3711_v53  ;;  %v1054_v52 = vld [vmem:[%s4711_s9 + $0x768] sm:$0xff]  ;;  %v3764_v53 = vcombine.low %v1041_v41, %v1045_v42  ;;  %v3773_v55 = vcombine.high %v1049_v49, %v1053_v50  ;;  %v848_v41 = vld [vmem:[%s4711_s9 + $0xf8] sm:$0xff] }
  0xef   : > { %v3775_v56 = vcombine.high %v1050_v51, %v1054_v52  ;;  %v3774_v62 = vcombine.low %v1050_v51, %v1054_v52 }
  0xf1   : > { %2447 = vmatpush1.bf16.msra.mxu0 %v3708_v58  ;;  %2529 = vmatpush1.bf16.msra.mxu1 %v3710_v59  ;;  %v1061_v58 = vld [vmem:[%s4711_s9 + $0x7a0] sm:$0xff]  ;;  %v1058_v59 = vld [vmem:[%s4711_s9 + $0x788] sm:$0xff] }
  0xf2   : > { %2448 = vmatprep.subr.bf16.mxu0 %v3717_v60  ;;  %2530 = vmatprep.subr.bf16.mxu1 %v3719_v61  ;;  %v1062_v60 = vld [vmem:[%s4711_s9 + $0x7a8] sm:$0xff]  ;;  %v3772_v61 = vcombine.low %v1049_v49, %v1053_v50  ;;  %v3781_v63 = vcombine.high %v1057_v57, %v1061_v58  ;;  %v859_v50 = vld [vmem:[%s4711_s9 + $0x150] sm:$0xff] }
  0xf3   : > { %v3783_v0 = vcombine.high %v1058_v59, %v1062_v60  ;;  %v3782_v7 = vcombine.low %v1058_v59, %v1062_v60 }
  0xf5   : > { %2449 = vmatpush1.bf16.msra.mxu0 %v3716_v3  ;;  %2531 = vmatpush1.bf16.msra.mxu1 %v3718_v4  ;;  %v1069_v3 = vld [vmem:[%s4711_s9 + $0x7e0] sm:$0xff]  ;;  %v1066_v4 = vld [vmem:[%s4711_s9 + $0x7c8] sm:$0xff] }
  0xf6   : > { %2450 = vmatprep.subr.bf16.mxu0 %v3725_v5  ;;  %2532 = vmatprep.subr.bf16.mxu1 %v3727_v6  ;;  %v1070_v5 = vld [vmem:[%s4711_s9 + $0x7e8] sm:$0xff]  ;;  %v3780_v6 = vcombine.low %v1057_v57, %v1061_v58  ;;  %v3789_v8 = vcombine.high %v1065_v2, %v1069_v3  ;;  %v867_v58 = vld [vmem:[%s4711_s9 + $0x190] sm:$0xff] }
  0xf7   : > { %v3791_v9 = vcombine.high %v1066_v4, %v1070_v5  ;;  %v3790_v17 = vcombine.low %v1066_v4, %v1070_v5 }
  0xf9   : > { %2451 = vmatpush1.bf16.msra.mxu0 %v3724_v11  ;;  %2533 = vmatpush1.bf16.msra.mxu1 %v3726_v12  ;;  %v823_v11 = vld [vmem:[%s4711_s9 + $0x30] sm:$0xff]  ;;  %v820_v12 = vld [vmem:[%s4711_s9 + $0x18] sm:$0xff] }
  0xfa   : > { %2452 = vmatprep.subr.bf16.mxu0 %v3733_v14  ;;  %2534 = vmatprep.subr.bf16.mxu1 %v3735_v15  ;;  %v824_v14 = vld [vmem:[%s4711_s9 + $0x38] sm:$0xff]  ;;  %v3788_v15 = vcombine.low %v1065_v2, %v1069_v3  ;;  %v3545_v18 = vcombine.high %v819_v10, %v823_v11  ;;  %v3544_v26 = vcombine.low %v819_v10, %v823_v11  ;;  %v875_v3 = vld [vmem:[%s4711_s9 + $0x1d0] sm:$0xff] }
  0xfb   : > { %v3547_v19 = vcombine.high %v820_v12, %v824_v14  ;;  %v3546_v27 = vcombine.low %v820_v12, %v824_v14  ;;  %v883_v11 = vld [vmem:[%s4711_s9 + $0x210] sm:$0xff] }
  0xfd   : > { %2453 = vmatpush1.bf16.msra.mxu0 %v3732_v20  ;;  %2535 = vmatpush1.bf16.msra.mxu1 %v3734_v21  ;;  %v827_v20 = vld [vmem:[%s4711_s9 + $0x50] sm:$0xff] }
  0xfe   : > { %2454 = vmatprep.subr.bf16.mxu0 %v3741_v22  ;;  %2536 = vmatprep.subr.bf16.mxu1 %v3743_v24  ;;  %v831_v21 = vld [vmem:[%s4711_s9 + $0x70] sm:$0xff]  ;;  %v4866_v22 = vpack.c.bf16 %v811_v16, %v811_v16  ;;  %v828_v24 = vld [vmem:[%s4711_s9 + $0x58] sm:$0xff] }
  0xff   : > { %v3553_v28 = vcombine.high %v827_v20, %v831_v21  ;;  %v3552_v34 = vcombine.low %v827_v20, %v831_v21  ;;  %v3554_v35 = vcombine.low %v828_v24, %v832_v25  ;;  %v891_v20 = vld [vmem:[%s4711_s9 + $0x250] sm:$0xff] }
 0x101   : > { %2455 = vmatpush1.bf16.msra.mxu0 %v3740_v29  ;;  %2537 = vmatpush1.bf16.msra.mxu1 %v3742_v30  ;;  %v3555_v29 = vcombine.high %v828_v24, %v832_v25  ;;  %v835_v30 = vld [vmem:[%s4711_s9 + $0x90] sm:$0xff] }
 0x102   : > { %2456 = vmatprep.subr.bf16.mxu0 %v3749_v31  ;;  %2538 = vmatprep.subr.bf16.mxu1 %v3751_v32  ;;  %v839_v31 = vld [vmem:[%s4711_s9 + $0xb0] sm:$0xff]  ;;  %v836_v32 = vld [vmem:[%s4711_s9 + $0x98] sm:$0xff] }
 0x103   : > { %v3561_v36 = vcombine.high %v835_v30, %v839_v31  ;;  %v3560_v42 = vcombine.low %v835_v30, %v839_v31  ;;  %v3562_v43 = vcombine.low %v836_v32, %v840_v33  ;;  %v895_v25 = vld [vmem:[%s4711_s9 + $0x270] sm:$0xff] }
 0x104   : > { %v899_v30 = vld [vmem:[%s4711_s9 + $0x290] sm:$0xff] }
 0x105   : > { %2457 = vmatpush1.bf16.msra.mxu0 %v3748_v37  ;;  %2539 = vmatpush1.bf16.msra.mxu1 %v3750_v38  ;;  %v3563_v37 = vcombine.high %v836_v32, %v840_v33  ;;  %v843_v38 = vld [vmem:[%s4711_s9 + $0xd0] sm:$0xff]  ;;  %v3617_v32 = vcombine.high %v891_v20, %v895_v25 }
 0x106   : > { %2458 = vmatprep.subr.bf16.mxu0 %v3757_v39  ;;  %2540 = vmatprep.subr.bf16.mxu1 %v3759_v40  ;;  %v847_v39 = vld [vmem:[%s4711_s9 + $0xf0] sm:$0xff]  ;;  %v844_v40 = vld [vmem:[%s4711_s9 + $0xd8] sm:$0xff] }
 0x107   : > { %v3569_v44 = vcombine.high %v843_v38, %v847_v39  ;;  %v3568_v49 = vcombine.low %v843_v38, %v847_v39  ;;  %v3570_v51 = vcombine.low %v844_v40, %v848_v41  ;;  %v903_v33 = vld [vmem:[%s4711_s9 + $0x2b0] sm:$0xff] }
 0x108   : > { %v907_v38 = vld [vmem:[%s4711_s9 + $0x2d0] sm:$0xff] }
 0x109   : > { %2459 = vmatpush1.bf16.msra.mxu0 %v3756_v45  ;;  %2541 = vmatpush1.bf16.msra.mxu1 %v3758_v46  ;;  %v3571_v45 = vcombine.high %v844_v40, %v848_v41  ;;  %v851_v46 = vld [vmem:[%s4711_s9 + $0x110] sm:$0xff]  ;;  %v3625_v41 = vcombine.high %v899_v30, %v903_v33 }
 0x10a   : > { %2460 = vmatprep.subr.bf16.mxu0 %v3765_v47  ;;  %2542 = vmatprep.subr.bf16.mxu1 %v3767_v48  ;;  %v855_v47 = vld [vmem:[%s4711_s9 + $0x130] sm:$0xff]  ;;  %v852_v48 = vld [vmem:[%s4711_s9 + $0x118] sm:$0xff] }
 0x10b   : > { %v3577_v52 = vcombine.high %v851_v46, %v855_v47  ;;  %v3576_v57 = vcombine.low %v851_v46, %v855_v47  ;;  %v911_v39 = vld [vmem:[%s4711_s9 + $0x2f0] sm:$0xff] }
 0x10c   : > { %v915_v46 = vld [vmem:[%s4711_s9 + $0x310] sm:$0xff] }
 0x10d   : > { %2461 = vmatpush1.bf16.msra.mxu0 %v3764_v53  ;;  %2543 = vmatpush1.bf16.msra.mxu1 %v3766_v54  ;;  %v863_v53 = vld [vmem:[%s4711_s9 + $0x170] sm:$0xff] }
 0x10e   : > { %2462 = vmatprep.subr.bf16.mxu0 %v3773_v55  ;;  %2544 = vmatprep.subr.bf16.mxu1 %v3775_v56  ;;  %v860_v55 = vld [vmem:[%s4711_s9 + $0x158] sm:$0xff]  ;;  %v3585_v60 = vcombine.high %v859_v50, %v863_v53  ;;  %v3584_v2 = vcombine.low %v859_v50, %v863_v53  ;;  %v919_v47 = vld [vmem:[%s4711_s9 + $0x330] sm:$0xff] }
 0x10f   : > { %v864_v56 = vld [vmem:[%s4711_s9 + $0x178] sm:$0xff]  ;;  %v923_v53 = vld [vmem:[%s4711_s9 + $0x350] sm:$0xff] }
 0x110   : > { %v3586_v4 = vcombine.low %v860_v55, %v864_v56  ;;  %v920_v50 = vld [vmem:[%s4711_s9 + $0x338] sm:$0xff] }
 0x111   : > { %2463 = vmatpush1.bf16.msra.mxu0 %v3772_v61  ;;  %2545 = vmatpush1.bf16.msra.mxu1 %v3774_v62  ;;  %v871_v61 = vld [vmem:[%s4711_s9 + $0x1b0] sm:$0xff]  ;;  %v3587_v62 = vcombine.high %v860_v55, %v864_v56  ;;  %v3641_v56 = vcombine.high %v915_v46, %v919_v47 }
 0x112   : > { %2464 = vmatprep.subr.bf16.mxu0 %v3781_v63  ;;  %2546 = vmatprep.subr.bf16.mxu1 %v3783_v0  ;;  %v868_v63 = vld [vmem:[%s4711_s9 + $0x198] sm:$0xff]  ;;  %v3593_v5 = vcombine.high %v867_v58, %v871_v61  ;;  %v3592_v10 = vcombine.low %v867_v58, %v871_v61  ;;  %v931_v61 = vld [vmem:[%s4711_s9 + $0x390] sm:$0xff] }
 0x113   : > { %v872_v0 = vld [vmem:[%s4711_s9 + $0x1b8] sm:$0xff] }
 0x114   : > { %v3594_v12 = vcombine.low %v868_v63, %v872_v0  ;;  %v928_v58 = vld [vmem:[%s4711_s9 + $0x378] sm:$0xff] }
 0x115   : > { %2465 = vmatpush1.bf16.msra.mxu0 %v3780_v6  ;;  %2547 = vmatpush1.bf16.msra.mxu1 %v3782_v7  ;;  %v879_v6 = vld [vmem:[%s4711_s9 + $0x1f0] sm:$0xff]  ;;  %v3595_v7 = vcombine.high %v868_v63, %v872_v0 }
 0x116   : > { %2466 = vmatprep.subr.bf16.mxu0 %v3789_v8  ;;  %2548 = vmatprep.subr.bf16.mxu1 %v3791_v9  ;;  %v876_v8 = vld [vmem:[%s4711_s9 + $0x1d8] sm:$0xff]  ;;  %v3601_v14 = vcombine.high %v875_v3, %v879_v6 }
 0x117   : > { %v880_v9 = vld [vmem:[%s4711_s9 + $0x1f8] sm:$0xff] }
 0x118   : > { %v3603_v16 = vcombine.high %v876_v8, %v880_v9  ;;  %v3602_v21 = vcombine.low %v876_v8, %v880_v9 }
 0x119   : > { %2467 = vmatpush1.bf16.msra.mxu0 %v3788_v15  ;;  %2549 = vmatpush1.bf16.msra.mxu1 %v3790_v17  ;;  %v887_v15 = vld [vmem:[%s4711_s9 + $0x230] sm:$0xff]  ;;  %v884_v17 = vld [vmem:[%s4711_s9 + $0x218] sm:$0xff] }
 0x11a   : > { %2559 = vmatprep.subr.bf16.mxu0 %v3545_v18  ;;  %2641 = vmatprep.subr.bf16.mxu1 %v3547_v19  ;;  %v888_v18 = vld [vmem:[%s4711_s9 + $0x238] sm:$0xff]  ;;  %v3600_v19 = vcombine.low %v875_v3, %v879_v6  ;;  %v3609_v24 = vcombine.high %v883_v11, %v887_v15  ;;  %v939_v6 = vld [vmem:[%s4711_s9 + $0x3d0] sm:$0xff] }
 0x11b   : > { %v3610_v31 = vcombine.low %v884_v17, %v888_v18  ;;  %v936_v3 = vld [vmem:[%s4711_s9 + $0x3b8] sm:$0xff] }
 0x11c   : > { %2469 = vmatmul.mubr.bf16.vlgmr.msra.gmra.mrb[0].mxu0 %v4866_v22  ;;  %2551 = vmatmul.mubr.bf16.vlgmr.msra.gmra.mrb[0].mxu1 %v4866_v22 }
 0x11d   : > { %2560 = vmatpush1.bf16.msra.mxu0 %v3544_v26  ;;  %2642 = vmatpush1.bf16.msra.mxu1 %v3546_v27  ;;  %v3611_v26 = vcombine.high %v884_v17, %v888_v18  ;;  %v892_v27 = vld [vmem:[%s4711_s9 + $0x258] sm:$0xff] }
 0x11e   : > { %2561 = vmatprep.subr.bf16.mxu0 %v3553_v28  ;;  %2643 = vmatprep.subr.bf16.mxu1 %v3555_v29  ;;  %v896_v28 = vld [vmem:[%s4711_s9 + $0x278] sm:$0xff]  ;;  %v3608_v29 = vcombine.low %v883_v11, %v887_v15  ;;  %v947_v15 = vld [vmem:[%s4711_s9 + $0x410] sm:$0xff] }
 0x11f   : > { %2591 = vmatprep.mubr.bf16.mxu0 %v4709_v1  ;;  %2673 = vmatprep.mubr.bf16.mxu1 %v4709_v1  ;;  %v856_v1 = vld [vmem:[%s4711_s9 + $0x138] sm:$0xff]  ;;  %v3618_v40 = vcombine.low %v892_v27, %v896_v28 }
 0x120   : > { %v3579_v54 = vcombine.high %v852_v48, %v856_v1  ;;  %v3578_v59 = vcombine.low %v852_v48, %v856_v1  ;;  %v3633_v1 = vcombine.high %v907_v38, %v911_v39  ;;  %v944_v11 = vld [vmem:[%s4711_s9 + $0x3f8] sm:$0xff] }
 0x121   : > { %2562 = vmatpush1.bf16.msra.mxu0 %v3552_v34  ;;  %2644 = vmatpush1.bf16.msra.mxu1 %v3554_v35  ;;  %v3619_v34 = vcombine.high %v892_v27, %v896_v28  ;;  %v900_v35 = vld [vmem:[%s4711_s9 + $0x298] sm:$0xff]  ;;  %v955_v28 = vld [vmem:[%s4711_s9 + $0x450] sm:$0xff] }
 0x122   : > { %2563 = vmatprep.subr.bf16.mxu0 %v3561_v36  ;;  %2645 = vmatprep.subr.bf16.mxu1 %v3563_v37  ;;  %v904_v36 = vld [vmem:[%s4711_s9 + $0x2b8] sm:$0xff]  ;;  %v3616_v37 = vcombine.low %v891_v20, %v895_v25 }
 0x123   : > { %v3626_v48 = vcombine.low %v900_v35, %v904_v36  ;;  %v952_v20 = vld [vmem:[%s4711_s9 + $0x438] sm:$0xff] }
 0x125   : > { %2564 = vmatpush1.bf16.msra.mxu0 %v3560_v42  ;;  %2646 = vmatpush1.bf16.msra.mxu1 %v3562_v43  ;;  %v908_v42 = vld [vmem:[%s4711_s9 + $0x2d8] sm:$0xff] }
 0x126   : > { %2565 = vmatprep.subr.bf16.mxu0 %v3569_v44  ;;  %2647 = vmatprep.subr.bf16.mxu1 %v3571_v45  ;;  %v912_v43 = vld [vmem:[%s4711_s9 + $0x2f8] sm:$0xff]  ;;  %v3627_v44 = vcombine.high %v900_v35, %v904_v36  ;;  %v3624_v45 = vcombine.low %v899_v30, %v903_v33  ;;  %v963_v36 = vld [vmem:[%s4711_s9 + $0x490] sm:$0xff] }
 0x127   : > { %v3634_v55 = vcombine.low %v908_v42, %v912_v43  ;;  %v956_v30 = vld [vmem:[%s4711_s9 + $0x458] sm:$0xff] }
 0x129   : > { %2566 = vmatpush1.bf16.msra.mxu0 %v3568_v49  ;;  %2648 = vmatpush1.bf16.msra.mxu1 %v3570_v51  ;;  %v916_v49 = vld [vmem:[%s4711_s9 + $0x318] sm:$0xff]  ;;  %v3635_v51 = vcombine.high %v908_v42, %v912_v43 }
 0x12a   : > { %2567 = vmatprep.subr.bf16.mxu0 %v3577_v52  ;;  %2649 = vmatprep.subr.bf16.mxu1 %v3579_v54  ;;  %v3632_v52 = vcombine.low %v907_v38, %v911_v39  ;;  %v927_v54 = vld [vmem:[%s4711_s9 + $0x370] sm:$0xff]  ;;  %v3642_v63 = vcombine.low %v916_v49, %v920_v50  ;;  %v964_v38 = vld [vmem:[%s4711_s9 + $0x498] sm:$0xff] }
 0x12b   : > { %v3649_v0 = vcombine.high %v923_v53, %v927_v54  ;;  %v968_v39 = vld [vmem:[%s4711_s9 + $0x4b8] sm:$0xff] }
 0x12c   : > { %v3691_v43 = vcombine.high %v964_v38, %v968_v39 }
 0x12d   : > { %2568 = vmatpush1.bf16.msra.mxu0 %v3576_v57  ;;  %2650 = vmatpush1.bf16.msra.mxu1 %v3578_v59  ;;  %v924_v57 = vld [vmem:[%s4711_s9 + $0x358] sm:$0xff]  ;;  %v3643_v59 = vcombine.high %v916_v49, %v920_v50  ;;  %v979_v50 = vld [vmem:[%s4711_s9 + $0x510] sm:$0xff] }
 0x12e   : > { %2569 = vmatprep.subr.bf16.mxu0 %v3585_v60  ;;  %2651 = vmatprep.subr.bf16.mxu1 %v3587_v62  ;;  %v3640_v60 = vcombine.low %v915_v46, %v919_v47  ;;  %v935_v62 = vld [vmem:[%s4711_s9 + $0x3b0] sm:$0xff]  ;;  %v3650_v8 = vcombine.low %v924_v57, %v928_v58  ;;  %v972_v46 = vld [vmem:[%s4711_s9 + $0x4d8] sm:$0xff] }
 0x12f   : > { %v3657_v9 = vcombine.high %v931_v61, %v935_v62  ;;  %v976_v47 = vld [vmem:[%s4711_s9 + $0x4f8] sm:$0xff] }
 0x130   : > { %v3699_v49 = vcombine.high %v972_v46, %v976_v47 }
 0x131   : > { %2570 = vmatpush1.bf16.msra.mxu0 %v3584_v2  ;;  %2652 = vmatpush1.bf16.msra.mxu1 %v3586_v4  ;;  %v932_v2 = vld [vmem:[%s4711_s9 + $0x398] sm:$0xff]  ;;  %v3651_v4 = vcombine.high %v924_v57, %v928_v58  ;;  %v987_v57 = vld [vmem:[%s4711_s9 + $0x550] sm:$0xff] }
 0x132   : > { %2571 = vmatprep.subr.bf16.mxu0 %v3593_v5  ;;  %2653 = vmatprep.subr.bf16.mxu1 %v3595_v7  ;;  %v3648_v5 = vcombine.low %v923_v53, %v927_v54  ;;  %v943_v7 = vld [vmem:[%s4711_s9 + $0x3f0] sm:$0xff]  ;;  %v3658_v17 = vcombine.low %v932_v2, %v936_v3  ;;  %v984_v53 = vld [vmem:[%s4711_s9 + $0x538] sm:$0xff] }
 0x133   : > { %v3665_v18 = vcombine.high %v939_v6, %v943_v7  ;;  %v991_v58 = vld [vmem:[%s4711_s9 + $0x570] sm:$0xff] }
 0x135   : > { %2572 = vmatpush1.bf16.msra.mxu0 %v3592_v10  ;;  %2654 = vmatpush1.bf16.msra.mxu1 %v3594_v12  ;;  %v940_v10 = vld [vmem:[%s4711_s9 + $0x3d8] sm:$0xff]  ;;  %v3659_v12 = vcombine.high %v932_v2, %v936_v3  ;;  %v995_v2 = vld [vmem:[%s4711_s9 + $0x590] sm:$0xff] }
 0x136   : > { %2573 = vmatprep.subr.bf16.mxu0 %v3601_v14  ;;  %2655 = vmatprep.subr.bf16.mxu1 %v3603_v16  ;;  %v3656_v14 = vcombine.low %v931_v61, %v935_v62  ;;  %v951_v16 = vld [vmem:[%s4711_s9 + $0x430] sm:$0xff]  ;;  %v3666_v25 = vcombine.low %v940_v10, %v944_v11 }
 0x137   : > { %v999_v3 = vld [vmem:[%s4711_s9 + $0x5b0] sm:$0xff] }
 0x139   : > { %2574 = vmatpush1.bf16.msra.mxu0 %v3600_v19  ;;  %2656 = vmatpush1.bf16.msra.mxu1 %v3602_v21  ;;  %v948_v19 = vld [vmem:[%s4711_s9 + $0x418] sm:$0xff]  ;;  %v3667_v21 = vcombine.high %v940_v10, %v944_v11  ;;  %v1003_v10 = vld [vmem:[%s4711_s9 + $0x5d0] sm:$0xff] }
 0x13a   : > { %2575 = vmatprep.subr.bf16.mxu0 %v3609_v24  ;;  %2657 = vmatprep.subr.bf16.mxu1 %v3611_v26  ;;  %v3664_v24 = vcombine.low %v939_v6, %v943_v7  ;;  %v3673_v26 = vcombine.high %v947_v15, %v951_v16  ;;  %v3675_v27 = vcombine.high %v948_v19, %v952_v20  ;;  %v1007_v11 = vld [vmem:[%s4711_s9 + $0x5f0] sm:$0xff] }
 0x13b   : > { %v3674_v33 = vcombine.low %v948_v19, %v952_v20  ;;  %v3712_v6 = vcombine.low %v987_v57, %v991_v58  ;;  %v1011_v19 = vld [vmem:[%s4711_s9 + $0x610] sm:$0xff] }
 0x13c   : > { %v1015_v20 = vld [vmem:[%s4711_s9 + $0x630] sm:$0xff] }
 0x13d   : > { %2576 = vmatpush1.bf16.msra.mxu0 %v3608_v29  ;;  %2658 = vmatpush1.bf16.msra.mxu1 %v3610_v31  ;;  %v959_v29 = vld [vmem:[%s4711_s9 + $0x470] sm:$0xff]  ;;  %v960_v31 = vld [vmem:[%s4711_s9 + $0x478] sm:$0xff] }
 0x13e   : > { %2577 = vmatprep.subr.bf16.mxu0 %v3617_v32  ;;  %2659 = vmatprep.subr.bf16.mxu1 %v3619_v34  ;;  %v3672_v32 = vcombine.low %v947_v15, %v951_v16  ;;  %v3681_v34 = vcombine.high %v955_v28, %v959_v29  ;;  %v3683_v35 = vcombine.high %v956_v30, %v960_v31 }
 0x13f   : > { %v3720_v15 = vcombine.low %v995_v2, %v999_v3 }
 0x141   : > { %2578 = vmatpush1.bf16.msra.mxu0 %v3616_v37  ;;  %2660 = vmatpush1.bf16.msra.mxu1 %v3618_v40  ;;  %v967_v37 = vld [vmem:[%s4711_s9 + $0x4b0] sm:$0xff]  ;;  %v3680_v40 = vcombine.low %v955_v28, %v959_v29 }
 0x142   : > { %2579 = vmatprep.subr.bf16.mxu0 %v3625_v41  ;;  %2661 = vmatprep.subr.bf16.mxu1 %v3627_v44  ;;  %v3682_v41 = vcombine.low %v956_v30, %v960_v31  ;;  %v3689_v42 = vcombine.high %v963_v36, %v967_v37  ;;  %v971_v44 = vld [vmem:[%s4711_s9 + $0x4d0] sm:$0xff]  ;;  %v1020_v31 = vld [vmem:[%s4711_s9 + $0x658] sm:$0xff] }
 0x143   : > { %v1019_v29 = vld [vmem:[%s4711_s9 + $0x650] sm:$0xff] }
 0x144   : > { %v1023_v30 = vld [vmem:[%s4711_s9 + $0x670] sm:$0xff] }
 0x145   : > { %2580 = vmatpush1.bf16.msra.mxu0 %v3624_v45  ;;  %2662 = vmatpush1.bf16.msra.mxu1 %v3626_v48  ;;  %v975_v45 = vld [vmem:[%s4711_s9 + $0x4f0] sm:$0xff]  ;;  %v3690_v48 = vcombine.low %v964_v38, %v968_v39  ;;  %v1028_v39 = vld [vmem:[%s4711_s9 + $0x698] sm:$0xff] }
 0x146   : > { %2581 = vmatprep.subr.bf16.mxu0 %v3633_v1  ;;  %2663 = vmatprep.subr.bf16.mxu1 %v3635_v51  ;;  %v3697_v1 = vcombine.high %v971_v44, %v975_v45  ;;  %v983_v51 = vld [vmem:[%s4711_s9 + $0x530] sm:$0xff]  ;;  %v3696_v54 = vcombine.low %v971_v44, %v975_v45 }
 0x147   : > { %v3704_v61 = vcombine.low %v979_v50, %v983_v51  ;;  %v1031_v38 = vld [vmem:[%s4711_s9 + $0x6b0] sm:$0xff] }
 0x148   : > { %v1035_v45 = vld [vmem:[%s4711_s9 + $0x6d0] sm:$0xff] }
 0x149   : > { %2582 = vmatpush1.bf16.msra.mxu0 %v3632_v52  ;;  %2664 = vmatpush1.bf16.msra.mxu1 %v3634_v55  ;;  %v980_v52 = vld [vmem:[%s4711_s9 + $0x518] sm:$0xff]  ;;  %v3705_v55 = vcombine.high %v979_v50, %v983_v51  ;;  %v1043_v51 = vld [vmem:[%s4711_s9 + $0x710] sm:$0xff] }
 0x14a   : > { %2583 = vmatprep.subr.bf16.mxu0 %v3641_v56  ;;  %2665 = vmatprep.subr.bf16.mxu1 %v3643_v59  ;;  %v3707_v56 = vcombine.high %v980_v52, %v984_v53  ;;  %v988_v59 = vld [vmem:[%s4711_s9 + $0x558] sm:$0xff]  ;;  %v3706_v62 = vcombine.low %v980_v52, %v984_v53  ;;  %v1047_v52 = vld [vmem:[%s4711_s9 + $0x730] sm:$0xff] }
 0x14b   : > { %v1044_v53 = vld [vmem:[%s4711_s9 + $0x718] sm:$0xff] }
 0x14d   : > { %2584 = vmatpush1.bf16.msra.mxu0 %v3640_v60  ;;  %2666 = vmatpush1.bf16.msra.mxu1 %v3642_v63  ;;  %v992_v60 = vld [vmem:[%s4711_s9 + $0x578] sm:$0xff]  ;;  %v3713_v63 = vcombine.high %v987_v57, %v991_v58  ;;  %v1051_v58 = vld [vmem:[%s4711_s9 + $0x750] sm:$0xff] }
 0x14e   : > { %2585 = vmatprep.subr.bf16.mxu0 %v3649_v0  ;;  %2667 = vmatprep.subr.bf16.mxu1 %v3651_v4  ;;  %v3715_v0 = vcombine.high %v988_v59, %v992_v60  ;;  %v996_v4 = vld [vmem:[%s4711_s9 + $0x598] sm:$0xff]  ;;  %v3714_v7 = vcombine.low %v988_v59, %v992_v60  ;;  %v1055_v59 = vld [vmem:[%s4711_s9 + $0x770] sm:$0xff] }
 0x14f   : > { %v1052_v60 = vld [vmem:[%s4711_s9 + $0x758] sm:$0xff] }
 0x151   : > { %2586 = vmatpush1.bf16.msra.mxu0 %v3648_v5  ;;  %2668 = vmatpush1.bf16.msra.mxu1 %v3650_v8  ;;  %v1000_v5 = vld [vmem:[%s4711_s9 + $0x5b8] sm:$0xff]  ;;  %v3721_v8 = vcombine.high %v995_v2, %v999_v3  ;;  %v1059_v3 = vld [vmem:[%s4711_s9 + $0x790] sm:$0xff] }
 0x152   : > { %2587 = vmatprep.subr.bf16.mxu0 %v3657_v9  ;;  %2669 = vmatprep.subr.bf16.mxu1 %v3659_v12  ;;  %v3723_v9 = vcombine.high %v996_v4, %v1000_v5  ;;  %v1004_v12 = vld [vmem:[%s4711_s9 + $0x5d8] sm:$0xff]  ;;  %v3722_v16 = vcombine.low %v996_v4, %v1000_v5  ;;  %v1063_v4 = vld [vmem:[%s4711_s9 + $0x7b0] sm:$0xff] }
 0x153   : > { %v1060_v5 = vld [vmem:[%s4711_s9 + $0x798] sm:$0xff] }
 0x155   : > { %2588 = vmatpush1.bf16.msra.mxu0 %v3656_v14  ;;  %2670 = vmatpush1.bf16.msra.mxu1 %v3658_v17  ;;  %v1008_v14 = vld [vmem:[%s4711_s9 + $0x5f8] sm:$0xff]  ;;  %v3729_v17 = vcombine.high %v1003_v10, %v1007_v11 }
 0x156   : > { %2589 = vmatprep.subr.bf16.mxu0 %v3665_v18  ;;  %2671 = vmatprep.subr.bf16.mxu1 %v3667_v21  ;;  %v3731_v18 = vcombine.high %v1004_v12, %v1008_v14  ;;  %v1012_v21 = vld [vmem:[%s4711_s9 + $0x618] sm:$0xff] }
 0x159   : > { %2590 = vmatpush1.bf16.msra.mxu0 %v3664_v24  ;;  %2672 = vmatpush1.bf16.msra.mxu1 %v3666_v25  ;;  %v1016_v24 = vld [vmem:[%s4711_s9 + $0x638] sm:$0xff]  ;;  %v3728_v25 = vcombine.low %v1003_v10, %v1007_v11  ;;  %v1067_v11 = vld [vmem:[%s4711_s9 + $0x7d0] sm:$0xff] }
 0x15a   : > { %2600 = vmatprep.subr.bf16.mxu0 %v3673_v26  ;;  %2682 = vmatprep.subr.bf16.mxu1 %v3675_v27  ;;  %v3730_v26 = vcombine.low %v1004_v12, %v1008_v14  ;;  %v3737_v27 = vcombine.high %v1011_v19, %v1015_v20  ;;  %v3739_v28 = vcombine.high %v1012_v21, %v1016_v24  ;;  %v1071_v12 = vld [vmem:[%s4711_s9 + $0x7f0] sm:$0xff]  ;;  %v1068_v14 = vld [vmem:[%s4711_s9 + $0x7d8] sm:$0xff] }
 0x15c   : > { %2592 = vmatmul.mubr.bf16.vlgmr.msra.gmra.mrb[4].mxu0 %v4788_v13  ;;  %2674 = vmatmul.mubr.bf16.vlgmr.msra.gmra.mrb[4].mxu1 %v4788_v13  ;;  %v3688_v13 = vcombine.low %v963_v36, %v967_v37  ;;  %v1027_v37 = vld [vmem:[%s4711_s9 + $0x690] sm:$0xff] }
 0x15d   : > { %2601 = vmatpush1.bf16.msra.mxu0 %v3672_v32  ;;  %2683 = vmatpush1.bf16.msra.mxu1 %v3674_v33  ;;  %v1024_v32 = vld [vmem:[%s4711_s9 + $0x678] sm:$0xff]  ;;  %v3736_v33 = vcombine.low %v1011_v19, %v1015_v20  ;;  %v3792_v20 = vcombine.low %v1067_v11, %v1071_v12 }
 0x15e   : > { %2602 = vmatprep.subr.bf16.mxu0 %v3681_v34  ;;  %2684 = vmatprep.subr.bf16.mxu1 %v3683_v35  ;;  %v3738_v34 = vcombine.low %v1012_v21, %v1016_v24  ;;  %v3745_v35 = vcombine.high %v1019_v29, %v1023_v30  ;;  %v3747_v36 = vcombine.high %v1020_v31, %v1024_v32  ;;  %v4015_v24 = vld [vmem:[%s4889_s26 + $0x40] sm:$0xff]  }
 0x15f   : > { %2632 = vmatprep.mubr.bf16.mxu0 %v4797_v23  ;;  %2714 = vmatprep.mubr.bf16.mxu1 %v4797_v23  ;;  %v3698_v23 = vcombine.low %v972_v46, %v976_v47  ;;  %v1039_v46 = vld [vmem:[%s4711_s9 + $0x6f0] sm:$0xff]  ;;  %v1036_v47 = vld [vmem:[%s4711_s9 + $0x6d8] sm:$0xff] }
 0x161   : > { %2603 = vmatpush1.bf16.msra.mxu0 %v3680_v40  ;;  %2685 = vmatpush1.bf16.msra.mxu1 %v3682_v41  ;;  %v1032_v40 = vld [vmem:[%s4711_s9 + $0x6b8] sm:$0xff]  ;;  %v3744_v41 = vcombine.low %v1019_v29, %v1023_v30  ;;  %v4020_v29 = vld [vmem:[%s4889_s26 + $0xc8] sm:$0xff]  }
 0x162   : > { %2604 = vmatprep.subr.bf16.mxu0 %v3689_v42  ;;  %2686 = vmatprep.subr.bf16.mxu1 %v3691_v43  ;;  %v3746_v42 = vcombine.low %v1020_v31, %v1024_v32  ;;  %v3753_v43 = vcombine.high %v1027_v37, %v1031_v38  ;;  %v3755_v44 = vcombine.high %v1028_v39, %v1032_v40  ;;  %v4021_v30 = vld [vmem:[%s4889_s26 + $0x8] sm:$0xff]   ;;  %v4023_v32 = vld [vmem:[%s4889_s26 + $0x50] sm:$0xff]  }
 0x163   : > { %v4022_v31 = vld [vmem:[%s4889_s26 + $0x88] sm:$0xff]  }
 0x165   : > { %2605 = vmatpush1.bf16.msra.mxu0 %v3688_v13  ;;  %2687 = vmatpush1.bf16.msra.mxu1 %v3690_v48  ;;  %v1040_v13 = vld [vmem:[%s4711_s9 + $0x6f8] sm:$0xff]  ;;  %v3752_v48 = vcombine.low %v1027_v37, %v1031_v38 }
 0x166   : > { %2606 = vmatprep.subr.bf16.mxu0 %v3697_v1  ;;  %2688 = vmatprep.subr.bf16.mxu1 %v3699_v49  ;;  %v3754_v1 = vcombine.low %v1028_v39, %v1032_v40  ;;  %v3761_v49 = vcombine.high %v1035_v45, %v1039_v46  ;;  %v3763_v50 = vcombine.high %v1036_v47, %v1040_v13  ;;  %v4029_v37 = vld [vmem:[%s4889_s26 + $0x18] sm:$0xff]   ;;  %v4031_v39 = vld [vmem:[%s4889_s26 + $0x60] sm:$0xff]  }
 0x167   : > { %v4030_v38 = vld [vmem:[%s4889_s26 + $0x98] sm:$0xff]   ;;  %v4032_v40 = vld [vmem:[%s4889_s26 + $0xe0] sm:$0xff]  }
 0x169   : > { %2607 = vmatpush1.bf16.msra.mxu0 %v3696_v54  ;;  %2689 = vmatpush1.bf16.msra.mxu1 %v3698_v23  ;;  %v1048_v54 = vld [vmem:[%s4711_s9 + $0x738] sm:$0xff]  ;;  %v3760_v23 = vcombine.low %v1035_v45, %v1039_v46  ;;  %v4037_v45 = vld [vmem:[%s4889_s26 + $0x28] sm:$0xff]  }
 0x16a   : > { %2608 = vmatprep.subr.bf16.mxu0 %v3705_v55  ;;  %2690 = vmatprep.subr.bf16.mxu1 %v3707_v56  ;;  %v3762_v55 = vcombine.low %v1036_v47, %v1040_v13  ;;  %v3769_v56 = vcombine.high %v1043_v51, %v1047_v52  ;;  %v3771_v57 = vcombine.high %v1044_v53, %v1048_v54  ;;  %v4038_v46 = vld [vmem:[%s4889_s26 + $0xa8] sm:$0xff]   ;;  %v4039_v47 = vld [vmem:[%s4889_s26 + $0x70] sm:$0xff]  }
 0x16b   : > { %v4040_v13 = vld [vmem:[%s4889_s26 + $0xf0] sm:$0xff]  }
 0x16d   : > { %2609 = vmatpush1.bf16.msra.mxu0 %v3704_v61  ;;  %2691 = vmatpush1.bf16.msra.mxu1 %v3706_v62  ;;  %v1056_v61 = vld [vmem:[%s4711_s9 + $0x778] sm:$0xff]  ;;  %v3768_v62 = vcombine.low %v1043_v51, %v1047_v52 }
 0x16e   : > { %2610 = vmatprep.subr.bf16.mxu0 %v3713_v63  ;;  %2692 = vmatprep.subr.bf16.mxu1 %v3715_v0  ;;  %v3770_v63 = vcombine.low %v1044_v53, %v1048_v54  ;;  %v3777_v0 = vcombine.high %v1051_v58, %v1055_v59  ;;  %v3779_v2 = vcombine.high %v1052_v60, %v1056_v61  ;;  %v4045_v51 = vld [vmem:[%s4889_s26 + $0x38] sm:$0xff]   ;;  %v4047_v53 = vld [vmem:[%s4889_s26 + $0x140] sm:$0xff]  }
 0x16f   : > { %v4046_v52 = vld [vmem:[%s4889_s26 + $0xb8] sm:$0xff]   ;;  %v4048_v54 = vld [vmem:[%s4889_s26 + $0x1c0] sm:$0xff]  }
 0x171   : > { %2611 = vmatpush1.bf16.msra.mxu0 %v3712_v6  ;;  %2693 = vmatpush1.bf16.msra.mxu1 %v3714_v7  ;;  %v1064_v6 = vld [vmem:[%s4711_s9 + $0x7b8] sm:$0xff]  ;;  %v3776_v7 = vcombine.low %v1051_v58, %v1055_v59 }
 0x172   : > { %2612 = vmatprep.subr.bf16.mxu0 %v3721_v8  ;;  %2694 = vmatprep.subr.bf16.mxu1 %v3723_v9  ;;  %v3778_v8 = vcombine.low %v1052_v60, %v1056_v61  ;;  %v3785_v9 = vcombine.high %v1059_v3, %v1063_v4  ;;  %v3787_v10 = vcombine.high %v1060_v5, %v1064_v6 }
 0x175   : > { %2613 = vmatpush1.bf16.msra.mxu0 %v3720_v15  ;;  %2695 = vmatpush1.bf16.msra.mxu1 %v3722_v16  ;;  %v1072_v15 = vld [vmem:[%s4711_s9 + $0x7f8] sm:$0xff]  ;;  %v3784_v16 = vcombine.low %v1059_v3, %v1063_v4 }
 0x176   : > { %2614 = vmatprep.subr.bf16.mxu0 %v3729_v17  ;;  %2696 = vmatprep.subr.bf16.mxu1 %v3731_v18  ;;  %v3786_v17 = vcombine.low %v1060_v5, %v1064_v6  ;;  %v3793_v18 = vcombine.high %v1067_v11, %v1071_v12  ;;  %v3795_v19 = vcombine.high %v1068_v14, %v1072_v15 }
 0x177   : > { %v3794_v21 = vcombine.low %v1068_v14, %v1072_v15 }
 0x179   : > { %2615 = vmatpush1.bf16.msra.mxu0 %v3728_v25  ;;  %2697 = vmatpush1.bf16.msra.mxu1 %v3730_v26  ;;  %v4016_v25 = vld [vmem:[%s4889_s26 + $0xc0] sm:$0xff]  }
 0x17a   : > { %2616 = vmatprep.subr.bf16.mxu0 %v3737_v27  ;;  %2698 = vmatprep.subr.bf16.mxu1 %v3739_v28  ;;  %v4017_v26 = vld [vmem:[%s4889_s26] sm:$0xff]   ;;  %v4019_v28 = vld [vmem:[%s4889_s26 + $0x48] sm:$0xff]  }
 0x17b   : > { %v4018_v27 = vld [vmem:[%s4889_s26 + $0x80] sm:$0xff]  }
 0x17d   : > { %2617 = vmatpush1.bf16.msra.mxu0 %v3736_v33  ;;  %2699 = vmatpush1.bf16.msra.mxu1 %v3738_v34  ;;  %v4024_v33 = vld [vmem:[%s4889_s26 + $0xd0] sm:$0xff]  }
 0x17e   : > { %2618 = vmatprep.subr.bf16.mxu0 %v3745_v35  ;;  %2700 = vmatprep.subr.bf16.mxu1 %v3747_v36  ;;  %v4025_v34 = vld [vmem:[%s4889_s26 + $0x10] sm:$0xff]   ;;  %v4028_v36 = vld [vmem:[%s4889_s26 + $0xd8] sm:$0xff]  }
 0x17f   : > { %v4026_v35 = vld [vmem:[%s4889_s26 + $0x90] sm:$0xff]  }
 0x181   : > { %2619 = vmatpush1.bf16.msra.mxu0 %v3744_v41  ;;  %2701 = vmatpush1.bf16.msra.mxu1 %v3746_v42  ;;  %v4033_v41 = vld [vmem:[%s4889_s26 + $0x20] sm:$0xff]  }
 0x182   : > { %2620 = vmatprep.subr.bf16.mxu0 %v3753_v43  ;;  %2702 = vmatprep.subr.bf16.mxu1 %v3755_v44  ;;  %v4034_v42 = vld [vmem:[%s4889_s26 + $0xa0] sm:$0xff]   ;;  %v4035_v43 = vld [vmem:[%s4889_s26 + $0x68] sm:$0xff]  }
 0x183   : > { %v4036_v44 = vld [vmem:[%s4889_s26 + $0xe8] sm:$0xff]  }
 0x185   : > { %2621 = vmatpush1.bf16.msra.mxu0 %v3752_v48  ;;  %2703 = vmatpush1.bf16.msra.mxu1 %v3754_v1  ;;  %v4041_v48 = vld [vmem:[%s4889_s26 + $0x30] sm:$0xff]  }
 0x186   : > { %2622 = vmatprep.subr.bf16.mxu0 %v3761_v49  ;;  %2704 = vmatprep.subr.bf16.mxu1 %v3763_v50  ;;  %v4042_v1 = vld [vmem:[%s4889_s26 + $0xb0] sm:$0xff]   ;;  %v4043_v49 = vld [vmem:[%s4889_s26 + $0x78] sm:$0xff]  }
 0x187   : > { %v4044_v50 = vld [vmem:[%s4889_s26 + $0xf8] sm:$0xff]  }
 0x189   : > { %2623 = vmatpush1.bf16.msra.mxu0 %v3760_v23  ;;  %2705 = vmatpush1.bf16.msra.mxu1 %v3762_v55  ;;  %v1075_v23 = vlaneseq }
 0x18a   : > { %2624 = vmatprep.subr.bf16.mxu0 %v3769_v56  ;;  %2706 = vmatprep.subr.bf16.mxu1 %v3771_v57  ;;  %v5047_v57 = vld [vmem:[%s793_s30] sm:$0xff] }
 0x18b   : > { %v5041_v55 = vshrl.u32 %v1075_v23, 7 }
 0x18d   : > { %2625 = vmatpush1.bf16.msra.mxu0 %v3768_v62  ;;  %2707 = vmatpush1.bf16.msra.mxu1 %v3770_v63  ;;  %v1077_v56 = vsub.s32 0, %v5041_v55  ;;  %v1085_v58 = vsub.s32 2, %v5041_v55  ;;  %v1081_v59 = vsub.s32 1, %v5041_v55  ;;  %v1089_v60 = vsub.s32 3, %v5041_v55 }
 0x18e   : > { %2626 = vmatprep.subr.bf16.mxu0 %v3777_v0  ;;  %2708 = vmatprep.subr.bf16.mxu1 %v3779_v2  ;;  %v1105_v23 = vsub.s32 7, %v5041_v55 }
 0x18f   : > { %v1078_v61 = vrot.slane %v5047_v57, %v1077_v56  ;;  %v1086_v62 = vrot.slane %v5047_v57, %v1085_v58  ;;  %v1082_v63 = vrot.slane %v5047_v57, %v1081_v59  ;;  %v1090_v0 = vrot.slane %v5047_v57, %v1089_v60 }
 0x190   : > { %v1106_v60 = vrot.slane %v5047_v57, %v1105_v23 }
 0x191   : > { %2627 = vmatpush1.bf16.msra.mxu0 %v3776_v7  ;;  %2709 = vmatpush1.bf16.msra.mxu1 %v3778_v8 }
 0x192   : > { %2628 = vmatprep.subr.bf16.mxu0 %v3785_v9  ;;  %2710 = vmatprep.subr.bf16.mxu1 %v3787_v10 }
 0x195   : > { %2629 = vmatpush1.bf16.msra.mxu0 %v3784_v16  ;;  %2711 = vmatpush1.bf16.msra.mxu1 %v3786_v17 }
 0x196   : > { %2630 = vmatprep.subr.bf16.mxu0 %v3793_v18  ;;  %2712 = vmatprep.subr.bf16.mxu1 %v3795_v19 }
 0x199   : > { %2631 = vmatpush1.bf16.msra.mxu0 %v3792_v20  ;;  %2713 = vmatpush1.bf16.msra.mxu1 %v3794_v21  ;;  %v4049_v20 = vld [vmem:[%s4889_s26 + $0x100] sm:$0xff]  }
 0x19a   : > { %3863 = vmatprep.subr.bf16.mxu0 %v4015_v24  ;;  %3885 = vmatprep.subr.bf16.mxu1 %v4016_v25  ;;  %v4050_v25 = vld [vmem:[%s4889_s26 + $0x180] sm:$0xff]  }
 0x19c   : > { %2633 = vmatmul.mubr.bf16.vlgmr.msra.gmra.mrb[4].mxu0 %v4866_v22  ;;  %2715 = vmatmul.mubr.bf16.vlgmr.msra.gmra.mrb[4].mxu1 %v4866_v22  ;;  %v4027_v22 = vld [vmem:[%s4889_s26 + $0x58] sm:$0xff]  }
 0x19d   : > { %3864 = vmatpush3.bf16.msra.mxu0 %v4017_v26  ;;  %3886 = vmatpush3.bf16.msra.mxu1 %v4018_v27  ;;  %v4051_v26 = vld [vmem:[%s4889_s26 + $0x148] sm:$0xff]  }
 0x19e   : > { %3865 = vmatprep.subr.bf16.mxu0 %v4019_v28  ;;  %3887 = vmatprep.subr.bf16.mxu1 %v4020_v29  ;;  %v4052_v28 = vld [vmem:[%s4889_s26 + $0x1c8] sm:$0xff]  }
 0x19f   : > { %v4053_v29 = vld [vmem:[%s4889_s26 + $0x108] sm:$0xff]  }
 0x1a1   : > { %3866 = vmatpush3.bf16.msra.mxu0 %v4021_v30  ;;  %3888 = vmatpush3.bf16.msra.mxu1 %v4022_v31  ;;  %v4054_v30 = vld [vmem:[%s4889_s26 + $0x188] sm:$0xff]   ;;  %v4055_v31 = vld [vmem:[%s4889_s26 + $0x150] sm:$0xff]  }
 0x1a2   : > { %3867 = vmatprep.subr.bf16.mxu0 %v4023_v32  ;;  %3889 = vmatprep.subr.bf16.mxu1 %v4024_v33  ;;  %v4056_v32 = vld [vmem:[%s4889_s26 + $0x1d0] sm:$0xff]  }
 0x1a3   : > { %v4057_v33 = vld [vmem:[%s4889_s26 + $0x110] sm:$0xff]  }
 0x1a5   : > { %3868 = vmatpush3.bf16.msra.mxu0 %v4025_v34  ;;  %3890 = vmatpush3.bf16.msra.mxu1 %v4026_v35  ;;  %v4058_v34 = vld [vmem:[%s4889_s26 + $0x190] sm:$0xff]   ;;  %v4059_v35 = vld [vmem:[%s4889_s26 + $0x158] sm:$0xff]  }
 0x1a6   : > { %3869 = vmatprep.subr.bf16.mxu0 %v4027_v22  ;;  %3891 = vmatprep.subr.bf16.mxu1 %v4028_v36  ;;  %v4060_v22 = vld [vmem:[%s4889_s26 + $0x1d8] sm:$0xff]  }
 0x1a7   : > { %v4061_v36 = vld [vmem:[%s4889_s26 + $0x118] sm:$0xff]  }
 0x1a9   : > { %3870 = vmatpush3.bf16.msra.mxu0 %v4029_v37  ;;  %3892 = vmatpush3.bf16.msra.mxu1 %v4030_v38  ;;  %v4062_v37 = vld [vmem:[%s4889_s26 + $0x198] sm:$0xff]   ;;  %v4063_v38 = vld [vmem:[%s4889_s26 + $0x160] sm:$0xff]  }
 0x1aa   : > { %3871 = vmatprep.subr.bf16.mxu0 %v4031_v39  ;;  %3893 = vmatprep.subr.bf16.mxu1 %v4032_v40  ;;  %v4064_v39 = vld [vmem:[%s4889_s26 + $0x1e0] sm:$0xff]  }
 0x1ab   : > { %v4065_v40 = vld [vmem:[%s4889_s26 + $0x120] sm:$0xff]  }
 0x1ad   : > { %3872 = vmatpush3.bf16.msra.mxu0 %v4033_v41  ;;  %3894 = vmatpush3.bf16.msra.mxu1 %v4034_v42  ;;  %v4066_v41 = vld [vmem:[%s4889_s26 + $0x1a0] sm:$0xff]   ;;  %v4067_v42 = vld [vmem:[%s4889_s26 + $0x168] sm:$0xff]  }
 0x1ae   : > { %3873 = vmatprep.subr.bf16.mxu0 %v4035_v43  ;;  %3895 = vmatprep.subr.bf16.mxu1 %v4036_v44  ;;  %v4068_v43 = vld [vmem:[%s4889_s26 + $0x1e8] sm:$0xff]  }
 0x1af   : > { %v4069_v44 = vld [vmem:[%s4889_s26 + $0x128] sm:$0xff]  }
 0x1b1   : > { %3874 = vmatpush3.bf16.msra.mxu0 %v4037_v45  ;;  %3896 = vmatpush3.bf16.msra.mxu1 %v4038_v46  ;;  %v4070_v45 = vld [vmem:[%s4889_s26 + $0x1a8] sm:$0xff]   ;;  %v4071_v46 = vld [vmem:[%s4889_s26 + $0x170] sm:$0xff]  }
 0x1b2   : > { %3875 = vmatprep.subr.bf16.mxu0 %v4039_v47  ;;  %3897 = vmatprep.subr.bf16.mxu1 %v4040_v13  ;;  %v4072_v47 = vld [vmem:[%s4889_s26 + $0x1f0] sm:$0xff]  }
 0x1b3   : > { %v4073_v13 = vld [vmem:[%s4889_s26 + $0x130] sm:$0xff]  }
 0x1b5   : > { %3876 = vmatpush3.bf16.msra.mxu0 %v4041_v48  ;;  %3898 = vmatpush3.bf16.msra.mxu1 %v4042_v1  ;;  %v4074_v48 = vld [vmem:[%s4889_s26 + $0x1b0] sm:$0xff]   ;;  %v4075_v1 = vld [vmem:[%s4889_s26 + $0x178] sm:$0xff]  }
 0x1b6   : > { %3877 = vmatprep.subr.bf16.mxu0 %v4043_v49  ;;  %3899 = vmatprep.subr.bf16.mxu1 %v4044_v50  ;;  %v4076_v49 = vld [vmem:[%s4889_s26 + $0x1f8] sm:$0xff]  }
 0x1b7   : > { %v4077_v50 = vld [vmem:[%s4889_s26 + $0x138] sm:$0xff]  }
 0x1b9   : > { %3878 = vmatpush3.bf16.msra.mxu0 %v4045_v51  ;;  %3900 = vmatpush3.bf16.msra.mxu1 %v4046_v52  ;;  %v4078_v51 = vld [vmem:[%s4889_s26 + $0x1b8] sm:$0xff]   ;;  %v1093_v52 = vsub.s32 4, %v5041_v55 }
 0x1ba   : > { %3907 = vmatprep.subr.bf16.mxu0 %v4047_v53  ;;  %3929 = vmatprep.subr.bf16.mxu1 %v4048_v54  ;;  %v1101_v53 = vsub.s32 6, %v5041_v55  ;;  %v1097_v54 = vsub.s32 5, %v5041_v55 }
 0x1bb   : > { %v1094_v56 = vrot.slane %v5047_v57, %v1093_v52 }
 0x1bc   : > { %v1102_v58 = vrot.slane %v5047_v57, %v1101_v53  ;;  %v1098_v59 = vrot.slane %v5047_v57, %v1097_v54 }
 0x1ef   : > { %v2470_v2 = vpop.f32.mrb[0].mxu0  ;;  %v2552_v4 = vpop.f32.mrb[0].mxu1 }
 0x1f0   : > { %v3951_v3 = vadd.f32 %v2470_v2, %v1078_v61  ;;  %v2472_v5 = vpop.f32.mrb[1].mxu0  ;;  %v3953_v6 = vadd.f32 %v2552_v4, %v1086_v62  ;;  %v2554_v8 = vpop.f32.mrb[1].mxu1 }
 0x1f1   : > { %v3952_v7 = vadd.f32 %v2472_v5, %v1082_v63  ;;  %v2474_v9 = vpop.f32.mrb[2].mxu0  ;;  %v3954_v11 = vadd.f32 %v2554_v8, %v1090_v0  ;;  %v2556_v12 = vpop.f32.mrb[2].mxu1 }
 0x1f2   : > { %v2723_v10 = vmax.f32 %v3951_v3, 0.0  ;;  %v2475_v14 = vpop.f32.mrb[3].mxu0  ;;  %v2725_v15 = vmax.f32 %v3953_v6, 0.0  ;;  %v2557_v17 = vpop.f32.mrb[3].mxu1 }
 0x1f3   : > { %v2724_v16 = vmax.f32 %v3952_v7, 0.0  ;;  %v2726_v18 = vmax.f32 %v3954_v11, 0.0 }
 0x1f4   : > { %v2731_v21 = vpack.c.bf16 %v2723_v10, %v2723_v10  ;;  %v2733_v27 = vpack.c.bf16 %v2725_v15, %v2725_v15 }
 0x1f5   : > { %v2732_v19 = vpack.c.bf16 %v2724_v16, %v2724_v16  ;;  %v2734_v24 = vpack.c.bf16 %v2726_v18, %v2726_v18 }
 0x1f7   : > { %3283 = vmatprep.mubr.bf16.mxu0 %v2732_v19  ;;  %3323 = vmatprep.mubr.bf16.mxu1 %v2734_v24 }
 0x1f8   : > { %3284 = vmatmul.mubr.bf16.vlgmr.msra.gmra.mrb[8].mxu0 %v2731_v21  ;;  %3324 = vmatmul.mubr.bf16.vlgmr.msra.gmra.mrb[8].mxu1 %v2733_v27 }
 0x1f9   : > { %3908 = vmatpush3.bf16.msra.mxu0 %v4049_v20  ;;  %3930 = vmatpush3.bf16.msra.mxu1 %v4050_v25 }
 0x1fa   : > { %3909 = vmatprep.subr.bf16.mxu0 %v4051_v26  ;;  %3931 = vmatprep.subr.bf16.mxu1 %v4052_v28 }
 0x1fd   : > { %3910 = vmatpush3.bf16.msra.mxu0 %v4053_v29  ;;  %3932 = vmatpush3.bf16.msra.mxu1 %v4054_v30 }
 0x1fe   : > { %3911 = vmatprep.subr.bf16.mxu0 %v4055_v31  ;;  %3933 = vmatprep.subr.bf16.mxu1 %v4056_v32 }
 0x201   : > { %3912 = vmatpush3.bf16.msra.mxu0 %v4057_v33  ;;  %3934 = vmatpush3.bf16.msra.mxu1 %v4058_v34 }
 0x202   : > { %3913 = vmatprep.subr.bf16.mxu0 %v4059_v35  ;;  %3935 = vmatprep.subr.bf16.mxu1 %v4060_v22 }
 0x205   : > { %3914 = vmatpush3.bf16.msra.mxu0 %v4061_v36  ;;  %3936 = vmatpush3.bf16.msra.mxu1 %v4062_v37 }
 0x206   : > { %3915 = vmatprep.subr.bf16.mxu0 %v4063_v38  ;;  %3937 = vmatprep.subr.bf16.mxu1 %v4064_v39 }
 0x209   : > { %3916 = vmatpush3.bf16.msra.mxu0 %v4065_v40  ;;  %3938 = vmatpush3.bf16.msra.mxu1 %v4066_v41 }
 0x20a   : > { %3917 = vmatprep.subr.bf16.mxu0 %v4067_v42  ;;  %3939 = vmatprep.subr.bf16.mxu1 %v4068_v43 }
 0x20d   : > { %3918 = vmatpush3.bf16.msra.mxu0 %v4069_v44  ;;  %3940 = vmatpush3.bf16.msra.mxu1 %v4070_v45 }
 0x20e   : > { %3919 = vmatprep.subr.bf16.mxu0 %v4071_v46  ;;  %3941 = vmatprep.subr.bf16.mxu1 %v4072_v47 }
 0x211   : > { %3920 = vmatpush3.bf16.msra.mxu0 %v4073_v13  ;;  %3942 = vmatpush3.bf16.msra.mxu1 %v4074_v48 }
 0x212   : > { %3921 = vmatprep.subr.bf16.mxu0 %v4075_v1  ;;  %3943 = vmatprep.subr.bf16.mxu1 %v4076_v49 }
 0x215   : > { %3922 = vmatpush3.bf16.msra.mxu0 %v4077_v50  ;;  %3944 = vmatpush3.bf16.msra.mxu1 %v4078_v51 }
 0x26f   : > { %v2634_v61 = vpop.f32.mrb[4].mxu0  ;;  %v2716_v63 = vpop.f32.mrb[4].mxu1 }
 0x270   : > { %v3955_v62 = vadd.f32 %v2634_v61, %v1094_v56  ;;  %v2636_v0 = vpop.f32.mrb[5].mxu0  ;;  %v3957_v2 = vadd.f32 %v2716_v63, %v1102_v58  ;;  %v2718_v4 = vpop.f32.mrb[5].mxu1 }
 0x271   : > { %v3956_v3 = vadd.f32 %v2636_v0, %v1098_v59  ;;  %v2638_v5 = vpop.f32.mrb[6].mxu0  ;;  %v3958_v7 = vadd.f32 %v2718_v4, %v1106_v60  ;;  %v2720_v8 = vpop.f32.mrb[6].mxu1 }
 0x272   : > { %v2727_v6 = vmax.f32 %v3955_v62, 0.0  ;;  %v2639_v55 = vpop.f32.mrb[7].mxu0  ;;  %v2729_v9 = vmax.f32 %v3957_v2, 0.0  ;;  %v2721_v11 = vpop.f32.mrb[7].mxu1 }
 0x273   : > { %v2728_v10 = vmax.f32 %v3956_v3, 0.0  ;;  %v2730_v12 = vmax.f32 %v3958_v7, 0.0 }
 0x274   : > { %v2735_v15 = vpack.c.bf16 %v2727_v6, %v2727_v6  ;;  %v2737_v57 = vpack.c.bf16 %v2729_v9, %v2729_v9 }
 0x275   : > { %v2736_v14 = vpack.c.bf16 %v2728_v10, %v2728_v10  ;;  %v2738_v16 = vpack.c.bf16 %v2730_v12, %v2730_v12 }
 0x277   : > { %3363 = vmatprep.mubr.bf16.mxu0 %v2736_v14  ;;  %3403 = vmatprep.mubr.bf16.mxu1 %v2738_v16 }
 0x278   : > { %3364 = vmatmul.mubr.bf16.vlgmr.msra.gmra.mrb[12].mxu0 %v2735_v15  ;;  %3404 = vmatmul.mubr.bf16.vlgmr.msra.gmra.mrb[12].mxu1 %v2737_v57 }
 0x2cb   : > { %v3879_v17 = vpop.f32.mrb[8].mxu0  ;;  %v3901_v18 = vpop.f32.mrb[8].mxu1 }
 0x2cc   : > { %v3880_v19 = vpop.f32.mrb[9].mxu0  ;;  %v3902_v21 = vpop.f32.mrb[9].mxu1 }
 0x2cd   : > { %v3881_v20 = vadd.f32 %v3880_v19, %v3879_v17  ;;  %v3882_v24 = vpop.f32.mrb[10].mxu0  ;;  %v3903_v25 = vadd.f32 %v3902_v21, %v3901_v18  ;;  %v3904_v26 = vpop.f32.mrb[10].mxu1 }
 0x2ce   : > { %v3883_v27 = vpop.f32.mrb[11].mxu0  ;;  %v3905_v28 = vpop.f32.mrb[11].mxu1 }
 0x2cf   : > { %v3326_v29 = vadd.f32 %v3903_v25, %v3881_v20 }
 0x34b   : > { %v3923_v30 = vpop.f32.mrb[12].mxu0  ;;  %v3945_v31 = vpop.f32.mrb[12].mxu1 }
 0x34c   : > { %v3924_v32 = vpop.f32.mrb[13].mxu0  ;;  %v3946_v34 = vpop.f32.mrb[13].mxu1 }
 0x34d   : > { %v3925_v33 = vadd.f32 %v3924_v32, %v3923_v30  ;;  %v3926_v35 = vpop.f32.mrb[14].mxu0  ;;  %v3947_v22 = vadd.f32 %v3946_v34, %v3945_v31  ;;  %v3948_v36 = vpop.f32.mrb[14].mxu1 }
 0x34e   : > { %v3927_v37 = vpop.f32.mrb[15].mxu0  ;;  %v3949_v39 = vpop.f32.mrb[15].mxu1 }
 0x34f   : > { %v3366_v38 = vadd.f32 %v3925_v33, %v3326_v29 }
 0x351   : > { %v3406_v40 = vadd.f32 %v3947_v22, %v3366_v38 }
 0x353   : > { %3411 = vst [vmem:[%s807_s8] sm:$0xff] %v3406_v40 }
 0x354 PF: > { %s14_s19 = sadd.s32 1, %s4117_s19   ;;  %s5119_s15 = smov %s4105_s16 }
 0x355   : > { %p11_p12 = scmp.ge.s32.totalorder %s14_s19, 4   ;;  %s5120_s16 = smov %s4179_s23 }
 0x356   : > { %s5121_s17 = smov %s4113_s18  ;;  %s5122_s18 = smov %s5124_s20 }
 0x357   :  { %13 = sbr.rel (!%p11_p12) target bundleno = 3 (0x3), region = 103 }

</bundles_post_ra>
